<compile_context>
chip_gen: v7x
topology: tpu7x:2x2x1
jax: 0.10.0
libtpu: 0.0.40
codegen_flags: <defaults>
</compile_context>

<pallas_src>
import functools

import jax
import jax.numpy as jnp
from jax.experimental import pallas as pl
from jax.experimental.pallas import tpu as pltpu

BN_EPS = 1e-5


# ---------------------------------------------------------------- Pallas kernels
def _res_block_kernel(x_ref, s1_ref, t1_ref, w1_ref, b1_ref, w2_ref, wu_ref, o_ref):
    """Fused residual block on a (TM, Cin) tile of input pixels.

      z = relu(x*s1 + t1)                  # bn1 + relu            (VPU)
      h = relu(z @ w1 + b1)                # 1x1 convT, bn2 folded (MXU + VPU)
      o = h @ w2 + x @ wu                  # conv2 contribution (b folded)
                                           # + upsample contribution (a, up_bn folded)
    o is the (TM, k*k*Cout) contribution slab; overlap-add + bias happen outside.
    """
    x = x_ref[...]
    z = jnp.maximum(x * s1_ref[...] + t1_ref[...], 0.0)
    h = jnp.dot(z.astype(jnp.bfloat16), w1_ref[...],
                preferred_element_type=jnp.float32) + b1_ref[...]
    h = jnp.maximum(h, 0.0)
    acc = jnp.dot(h.astype(jnp.bfloat16), w2_ref[...],
                  preferred_element_type=jnp.float32)
    acc = acc + jnp.dot(x.astype(jnp.bfloat16), wu_ref[...],
                        preferred_element_type=jnp.float32)
    o_ref[...] = acc


def _matmul_kernel(x_ref, w_ref, o_ref):
    """Final conv: (TM, Cin) @ (Cin, Npad) contribution matmul, bf16 operands."""
    o_ref[...] = jnp.dot(x_ref[...].astype(jnp.bfloat16), w_ref[...],
                         preferred_element_type=jnp.float32)


# ---------------------------------------------------------------- call wrappers
def _choose_tm(m):
    """Largest tile that divides m exactly with >=2 grid steps (else whole slab)."""
    for cand in (512, 256, 128, 64, 32, 16, 8):
        if m % cand == 0 and m // cand >= 2:
            return cand
    return m  # single block equal to the full dim (layout rule satisfied)


def res_block_contrib(x2d, p):
    m, cin = x2d.shape
    n = p["w2"].shape[1]
    tm = _choose_tm(m)
    return pl.pallas_call(
        _res_block_kernel,
        out_shape=jax.ShapeDtypeStruct((m, n), jnp.float32),
        grid_spec=pltpu.PrefetchScalarGridSpec(
            num_scalar_prefetch=0,
            grid=(m // tm,),
            in_specs=[
                pl.BlockSpec((tm, cin), lambda i: (i, 0)),   # x tile
                pl.BlockSpec((1, cin), lambda i: (0, 0)),    # bn1 scale
                pl.BlockSpec((1, cin), lambda i: (0, 0)),    # bn1 shift
                pl.BlockSpec((cin, cin), lambda i: (0, 0)),  # conv1 weight (bn2 folded)
                pl.BlockSpec((1, cin), lambda i: (0, 0)),    # conv1 bias  (bn2 folded)
                pl.BlockSpec((cin, n), lambda i: (0, 0)),    # conv2 contrib weight (*b)
                pl.BlockSpec((cin, n), lambda i: (0, 0)),    # upsample contrib weight (*a, up_bn)
            ],
            out_specs=pl.BlockSpec((tm, n), lambda i: (i, 0)),
        ),
        compiler_params=pltpu.CompilerParams(dimension_semantics=("parallel",)),
    )(x2d, p["s1"], p["t1"], p["w1"], p["b1"], p["w2"], p["wu"])


def matmul_contrib(x2d, w):
    m, k = x2d.shape
    n = w.shape[1]
    tm = _choose_tm(m)
    return pl.pallas_call(
        _matmul_kernel,
        out_shape=jax.ShapeDtypeStruct((m, n), jnp.float32),
        grid_spec=pltpu.PrefetchScalarGridSpec(
            num_scalar_prefetch=0,
            grid=(m // tm,),
            in_specs=[
                pl.BlockSpec((tm, k), lambda i: (i, 0)),
                pl.BlockSpec((k, n), lambda i: (0, 0)),
            ],
            out_specs=pl.BlockSpec((tm, n), lambda i: (i, 0)),
        ),
        compiler_params=pltpu.CompilerParams(dimension_semantics=("parallel",)),
    )(x2d, w)


# ------------------------------------------------------------------ XLA glue ops
def overlap_add(contrib, B, H, W, k, s, p, op, cout, bias):
    """Scatter the per-input-pixel k*k*Cout contributions onto the ConvT output.

    contrib : (B*H*W, k*k*cout) f32; element (b,h,w,kh,kw,co) lands at output
    pixel (h*s - p + kh, w*s - p + kw).  bias is added once per output pixel.
    """
    c = contrib.reshape(B, H, W, k, k, cout)
    Ho = (H - 1) * s - 2 * p + k + op
    Wo = (W - 1) * s - 2 * p + k + op
    Hc = (H - 1) * s + k + op
    Wc = (W - 1) * s + k + op
    span_h = (H - 1) * s + 1
    span_w = (W - 1) * s + 1
    canvas = jnp.zeros((B, Hc, Wc, cout), contrib.dtype)
    for kh in range(k):
        for kw in range(k):
            canvas = canvas.at[:, kh:kh + span_h:s, kw:kw + span_w:s, :].add(
                c[:, :, :, kh, kw, :])
    return canvas[:, p:p + Ho, p:p + Wo, :] + bias[None, None, None, :]


def res_block(x_nhwc, p, cfg):
    cin, cout, k, s, pad, op = cfg
    B, H, W, _ = x_nhwc.shape
    contrib = res_block_contrib(x_nhwc.reshape(-1, cin), p)
    return overlap_add(contrib, B, H, W, k, s, pad, op, cout, p["bias_out"])


def final_conv(x_nhwc, p, cfg):
    cin, cout, k, s, pad, op = cfg
    B, H, W, _ = x_nhwc.shape
    contrib = matmul_contrib(x_nhwc.reshape(-1, cin), p["w"])[:, : k * k * cout]
    return overlap_add(contrib, B, H, W, k, s, pad, op, cout, p["bias_out"])


# ----------------------------------------------------------------- full forward
def data_generator_img(feats_nchw, params, cfgs):
    x = jnp.transpose(feats_nchw, (0, 2, 3, 1))        # NCHW -> NHWC
    for i in range(4):
        x = res_block(x, params["rb%d" % (i + 1)], cfgs[i])
    x = final_conv(x, params["conv"], cfgs[4])
    return jnp.transpose(x, (0, 3, 1, 2))               # NHWC -> NCHW


@functools.partial(jax.jit, static_argnames=("cfgs",))
def forward(feats_nchw, params, cfgs):
    return data_generator_img(feats_nchw, params, cfgs)


# ------------------------------------------------------------- parameter prep
def _bn_scale_shift(key, c):
    k1, k2, k3, k4 = jax.random.split(key, 4)
    gamma = 1.0 + 0.1 * jax.random.normal(k1, (c,), jnp.float32)
    beta = 0.1 * jax.random.normal(k2, (c,), jnp.float32)
    mean = 0.1 * jax.random.normal(k3, (c,), jnp.float32)
    var = 1.0 + 0.1 * jnp.abs(jax.random.normal(k4, (c,), jnp.float32))
    scale = gamma / jnp.sqrt(var + BN_EPS)
    shift = beta - mean * scale
    return scale, shift


def _convT_w(key, cin, cout, k):
    k1, k2 = jax.random.split(key)
    std = 1.0 / jnp.sqrt(float(cin * k * k))
    w = std * jax.random.normal(k1, (cin, cout, k, k), jnp.float32)  # PyTorch layout
    b = 0.05 * jax.random.normal(k2, (cout,), jnp.float32)
    return w, b


def _fold_res_block(key, cfg, a, b):
    cin, cout, k, s, pad, op = cfg
    ks = jax.random.split(key, 6)
    s1, t1 = _bn_scale_shift(ks[0], cin)          # bn1
    c1_w, c1_b = _convT_w(ks[1], cin, cin, 1)     # conv1 (1x1 convT)
    s2, t2 = _bn_scale_shift(ks[2], cin)          # bn2
    c2_w, c2_b = _convT_w(ks[3], cin, cout, k)    # conv2
    up_w, up_b = _convT_w(ks[4], cin, cout, k)    # upsample convT
    su, tu = _bn_scale_shift(ks[5], cout)         # upsample BN

    # conv1 matrix with bn2 folded onto its output channels
    w1 = c1_w[:, :, 0, 0] * s2[None, :]
    b1 = c1_b * s2 + t2

    # contribution matrices (ci, kh, kw, co) -> (ci, k*k*co); no spatial flip needed
    w2c = jnp.transpose(b * c2_w, (0, 2, 3, 1)).reshape(cin, k * k * cout)
    up_f = up_w * (a * su)[None, :, None, None]          # fold a and up_bn scale
    wuc = jnp.transpose(up_f, (0, 2, 3, 1)).reshape(cin, k * k * cout)
    bias_out = b * c2_b + a * (up_b * su + tu)            # once per output pixel

    return dict(
        s1=s1.reshape(1, cin), t1=t1.reshape(1, cin),
        w1=w1.astype(jnp.bfloat16), b1=b1.reshape(1, cin),
        w2=w2c.astype(jnp.bfloat16), wu=wuc.astype(jnp.bfloat16),
        bias_out=bias_out,
    )


def _fold_final_conv(key, cfg):
    cin, cout, k, s, pad, op = cfg
    w, bias = _convT_w(key, cin, cout, k)
    wc = jnp.transpose(w, (0, 2, 3, 1)).reshape(cin, k * k * cout)
    n_pad = ((k * k * cout + 127) // 128) * 128            # lane-dense stores
    wcp = jnp.zeros((cin, n_pad), jnp.float32).at[:, : k * k * cout].set(wc)
    return dict(w=wcp.astype(jnp.bfloat16), bias_out=bias)


def init_params(key, filter_dim_img, image_channels, a, b):
    F = filter_dim_img
    cfgs = (                                  # (cin, cout, k, stride, pad, out_pad)
        (5 * F, 4 * F, 4, 1, 0, 0),
        (4 * F, 3 * F, 4, 2, 1, 0),
        (3 * F, 2 * F, 4, 2, 1, 0),
        (2 * F, 1 * F, 4, 2, 1, 0),
        (1 * F, image_channels, 3, 2, 1, 1),
    )
    ks = jax.random.split(key, 5)
    params = {"rb%d" % (i + 1): _fold_res_block(ks[i], cfgs[i], a, b)
              for i in range(4)}
    params["conv"] = _fold_final_conv(ks[4], cfgs[4])
    return params, cfgs


# ------------------------------------------------------------------------- main
if __name__ == "__main__":
    # cfg.dataset.filter_dim_img = 8, cfg.dataset.image_channels = 3, a=0.5, b=1.0
    FILTER_DIM = 8
    IMG_CH = 3
    A_VAL, B_VAL = 0.5, 1.0

    key = jax.random.PRNGKey(0)
    k_in, k_par = jax.random.split(key)

    # latent feature map, NCHW (B, 5*F, 1, 1) as in the MoPoE image decoder
    feats = jax.random.normal(k_in, (2, 5 * FILTER_DIM, 1, 1), jnp.float32)
    params, cfgs = init_params(k_par, FILTER_DIM, IMG_CH, A_VAL, B_VAL)

    out = forward(feats, params, cfgs)
    out = jax.block_until_ready(out)

    assert out.shape == (2, IMG_CH, 64, 64), out.shape
    assert out.dtype == jnp.float32
    assert bool(jnp.all(jnp.isfinite(out)))
    print("KERNEL_OK")
</pallas_src>

<mosaic_0001>
module attributes {stable_mosaic.version = 11 : i64} {
  func.func @_res_block_kernel(%arg0: i32, %arg1: memref<2x40xf32, #tpu.memory_space<vmem>>, %arg2: memref<1x40xf32, #tpu.memory_space<vmem>>, %arg3: memref<1x40xf32, #tpu.memory_space<vmem>>, %arg4: memref<40x40xbf16, #tpu.memory_space<vmem>>, %arg5: memref<1x40xf32, #tpu.memory_space<vmem>>, %arg6: memref<40x512xbf16, #tpu.memory_space<vmem>>, %arg7: memref<40x512xbf16, #tpu.memory_space<vmem>>, %arg8: memref<2x512xf32, #tpu.memory_space<vmem>>) attributes {dimension_semantics = [#tpu.dimension_semantics<parallel>], iteration_bounds = array<i64: 1>, scalar_prefetch = 0 : i64, scratch_operands = 0 : i64, tpu.core_type = #tpu.core_type<tc>, window_params = [{transform_indices = @transform_0, window_bounds = array<i64: 2, 40>}, {pipeline_mode = #tpu.pipeline_mode<synchronous>, transform_indices = @transform_1, window_bounds = array<i64: 1, 40>}, {pipeline_mode = #tpu.pipeline_mode<synchronous>, transform_indices = @transform_2, window_bounds = array<i64: 1, 40>}, {pipeline_mode = #tpu.pipeline_mode<synchronous>, transform_indices = @transform_3, window_bounds = array<i64: 40, 40>}, {pipeline_mode = #tpu.pipeline_mode<synchronous>, transform_indices = @transform_4, window_bounds = array<i64: 1, 40>}, {pipeline_mode = #tpu.pipeline_mode<synchronous>, transform_indices = @transform_5, window_bounds = array<i64: 40, 512>}, {pipeline_mode = #tpu.pipeline_mode<synchronous>, transform_indices = @transform_6, window_bounds = array<i64: 40, 512>}, {transform_indices = @transform_7, window_bounds = array<i64: 2, 512>}]} {
    %c0 = arith.constant 0 : index
    %c0_0 = arith.constant 0 : index
    %0 = vector.load %arg1[%c0, %c0_0] : memref<2x40xf32, #tpu.memory_space<vmem>>, vector<2x40xf32>
    %c0_1 = arith.constant 0 : index
    %c0_2 = arith.constant 0 : index
    %1 = vector.load %arg2[%c0_1, %c0_2] : memref<1x40xf32, #tpu.memory_space<vmem>>, vector<1x40xf32>
    %2 = vector.broadcast %1 : vector<1x40xf32> to vector<2x40xf32>
    %3 = arith.mulf %0, %2 : vector<2x40xf32>
    %c0_3 = arith.constant 0 : index
    %c0_4 = arith.constant 0 : index
    %4 = vector.load %arg3[%c0_3, %c0_4] : memref<1x40xf32, #tpu.memory_space<vmem>>, vector<1x40xf32>
    %5 = vector.broadcast %4 : vector<1x40xf32> to vector<2x40xf32>
    %6 = arith.addf %3, %5 : vector<2x40xf32>
    %cst = arith.constant 0.000000e+00 : f32
    %7 = vector.broadcast %cst : f32 to vector<2x40xf32>
    %8 = arith.maximumf %6, %7 : vector<2x40xf32>
    %9 = arith.truncf %8 : vector<2x40xf32> to vector<2x40xbf16>
    %c0_5 = arith.constant 0 : index
    %c0_6 = arith.constant 0 : index
    %10 = vector.load %arg4[%c0_5, %c0_6] : memref<40x40xbf16, #tpu.memory_space<vmem>>, vector<40x40xbf16>
    %cst_7 = arith.constant dense<0.000000e+00> : vector<2x40xf32>
    %11 = tpu.matmul %9, %10, %cst_7 {dimension_numbers = #tpu.dot_dimension_numbers<[1], [0], [0], [1], [0, 0, 1, 1], [], []>} : vector<2x40xbf16>, vector<40x40xbf16>, vector<2x40xf32> -> vector<2x40xf32>
    %c0_8 = arith.constant 0 : index
    %c0_9 = arith.constant 0 : index
    %12 = vector.load %arg5[%c0_8, %c0_9] : memref<1x40xf32, #tpu.memory_space<vmem>>, vector<1x40xf32>
    %13 = vector.broadcast %12 : vector<1x40xf32> to vector<2x40xf32>
    %14 = arith.addf %11, %13 : vector<2x40xf32>
    %cst_10 = arith.constant 0.000000e+00 : f32
    %15 = vector.broadcast %cst_10 : f32 to vector<2x40xf32>
    %16 = arith.maximumf %14, %15 : vector<2x40xf32>
    %17 = arith.truncf %16 : vector<2x40xf32> to vector<2x40xbf16>
    %c0_11 = arith.constant 0 : index
    %c0_12 = arith.constant 0 : index
    %18 = vector.load %arg6[%c0_11, %c0_12] : memref<40x512xbf16, #tpu.memory_space<vmem>>, vector<40x512xbf16>
    %cst_13 = arith.constant dense<0.000000e+00> : vector<2x512xf32>
    %19 = tpu.matmul %17, %18, %cst_13 {dimension_numbers = #tpu.dot_dimension_numbers<[1], [0], [0], [1], [0, 0, 1, 1], [], []>} : vector<2x40xbf16>, vector<40x512xbf16>, vector<2x512xf32> -> vector<2x512xf32>
    %20 = arith.truncf %0 : vector<2x40xf32> to vector<2x40xbf16>
    %c0_14 = arith.constant 0 : index
    %c0_15 = arith.constant 0 : index
    %21 = vector.load %arg7[%c0_14, %c0_15] : memref<40x512xbf16, #tpu.memory_space<vmem>>, vector<40x512xbf16>
    %cst_16 = arith.constant dense<0.000000e+00> : vector<2x512xf32>
    %22 = tpu.matmul %20, %21, %cst_16 {dimension_numbers = #tpu.dot_dimension_numbers<[1], [0], [0], [1], [0, 0, 1, 1], [], []>} : vector<2x40xbf16>, vector<40x512xbf16>, vector<2x512xf32> -> vector<2x512xf32>
    %23 = arith.addf %19, %22 : vector<2x512xf32>
    %c0_17 = arith.constant 0 : index
    %c0_18 = arith.constant 0 : index
    %24 = vector.load %arg8[%c0_17, %c0_18] : memref<2x512xf32, #tpu.memory_space<vmem>>, vector<2x512xf32>
    tpu.vector_store %arg8[%c0_17, %c0_18], %23 {strides = array<i32>} : memref<2x512xf32, #tpu.memory_space<vmem>>, vector<2x512xf32>,
    return
  }
  func.func @transform_0(%arg0: i32) -> (i32, i32) {
    %c0_i32 = arith.constant 0 : i32
    %c0_i32_0 = arith.constant 0 : i32
    return %arg0, %c0_i32 : i32, i32
  }
  func.func @transform_1(%arg0: i32) -> (i32, i32) {
    %c0_i32 = arith.constant 0 : i32
    %c0_i32_0 = arith.constant 0 : i32
    %c0_i32_1 = arith.constant 0 : i32
    return %c0_i32, %c0_i32_0 : i32, i32
  }
  func.func @transform_2(%arg0: i32) -> (i32, i32) {
    %c0_i32 = arith.constant 0 : i32
    %c0_i32_0 = arith.constant 0 : i32
    %c0_i32_1 = arith.constant 0 : i32
    return %c0_i32, %c0_i32_0 : i32, i32
  }
  func.func @transform_3(%arg0: i32) -> (i32, i32) {
    %c0_i32 = arith.constant 0 : i32
    %c0_i32_0 = arith.constant 0 : i32
    %c0_i32_1 = arith.constant 0 : i32
    return %c0_i32, %c0_i32_0 : i32, i32
  }
  func.func @transform_4(%arg0: i32) -> (i32, i32) {
    %c0_i32 = arith.constant 0 : i32
    %c0_i32_0 = arith.constant 0 : i32
    %c0_i32_1 = arith.constant 0 : i32
    return %c0_i32, %c0_i32_0 : i32, i32
  }
  func.func @transform_5(%arg0: i32) -> (i32, i32) {
    %c0_i32 = arith.constant 0 : i32
    %c0_i32_0 = arith.constant 0 : i32
    %c0_i32_1 = arith.constant 0 : i32
    return %c0_i32, %c0_i32_0 : i32, i32
  }
  func.func @transform_6(%arg0: i32) -> (i32, i32) {
    %c0_i32 = arith.constant 0 : i32
    %c0_i32_0 = arith.constant 0 : i32
    %c0_i32_1 = arith.constant 0 : i32
    return %c0_i32, %c0_i32_0 : i32, i32
  }
  func.func @transform_7(%arg0: i32) -> (i32, i32) {
    %c0_i32 = arith.constant 0 : i32
    %c0_i32_0 = arith.constant 0 : i32
    return %arg0, %c0_i32 : i32, i32
  }
}

module attributes {stable_mosaic.version = 11 : i64} {
  func.func @_res_block_kernel(%arg0: i32, %arg1: memref<16x32xf32, #tpu.memory_space<vmem>>, %arg2: memref<1x32xf32, #tpu.memory_space<vmem>>, %arg3: memref<1x32xf32, #tpu.memory_space<vmem>>, %arg4: memref<32x32xbf16, #tpu.memory_space<vmem>>, %arg5: memref<1x32xf32, #tpu.memory_space<vmem>>, %arg6: memref<32x384xbf16, #tpu.memory_space<vmem>>, %arg7: memref<32x384xbf16, #tpu.memory_space<vmem>>, %arg8: memref<16x384xf32, #tpu.memory_space<vmem>>) attributes {dimension_semantics = [#tpu.dimension_semantics<parallel>], iteration_bounds = array<i64: 2>, scalar_prefetch = 0 : i64, scratch_operands = 0 : i64, tpu.core_type = #tpu.core_type<tc>, window_params = [{transform_indices = @transform_0, window_bounds = array<i64: 16, 32>}, {pipeline_mode = #tpu.pipeline_mode<synchronous>, transform_indices = @transform_1, window_bounds = array<i64: 1, 32>}, {pipeline_mode = #tpu.pipeline_mode<synchronous>, transform_indices = @transform_2, window_bounds = array<i64: 1, 32>}, {pipeline_mode = #tpu.pipeline_mode<synchronous>, transform_indices = @transform_3, window_bounds = array<i64: 32, 32>}, {pipeline_mode = #tpu.pipeline_mode<synchronous>, transform_indices = @transform_4, window_bounds = array<i64: 1, 32>}, {pipeline_mode = #tpu.pipeline_mode<synchronous>, transform_indices = @transform_5, window_bounds = array<i64: 32, 384>}, {pipeline_mode = #tpu.pipeline_mode<synchronous>, transform_indices = @transform_6, window_bounds = array<i64: 32, 384>}, {transform_indices = @transform_7, window_bounds = array<i64: 16, 384>}]} {
    %c0 = arith.constant 0 : index
    %c0_0 = arith.constant 0 : index
    %0 = vector.load %arg1[%c0, %c0_0] : memref<16x32xf32, #tpu.memory_space<vmem>>, vector<16x32xf32>
    %c0_1 = arith.constant 0 : index
    %c0_2 = arith.constant 0 : index
    %1 = vector.load %arg2[%c0_1, %c0_2] : memref<1x32xf32, #tpu.memory_space<vmem>>, vector<1x32xf32>
    %2 = vector.broadcast %1 : vector<1x32xf32> to vector<16x32xf32>
    %3 = arith.mulf %0, %2 : vector<16x32xf32>
    %c0_3 = arith.constant 0 : index
    %c0_4 = arith.constant 0 : index
    %4 = vector.load %arg3[%c0_3, %c0_4] : memref<1x32xf32, #tpu.memory_space<vmem>>, vector<1x32xf32>
    %5 = vector.broadcast %4 : vector<1x32xf32> to vector<16x32xf32>
    %6 = arith.addf %3, %5 : vector<16x32xf32>
    %cst = arith.constant 0.000000e+00 : f32
    %7 = vector.broadcast %cst : f32 to vector<16x32xf32>
    %8 = arith.maximumf %6, %7 : vector<16x32xf32>
    %9 = arith.truncf %8 : vector<16x32xf32> to vector<16x32xbf16>
    %c0_5 = arith.constant 0 : index
    %c0_6 = arith.constant 0 : index
    %10 = vector.load %arg4[%c0_5, %c0_6] : memref<32x32xbf16, #tpu.memory_space<vmem>>, vector<32x32xbf16>
    %cst_7 = arith.constant dense<0.000000e+00> : vector<16x32xf32>
    %11 = tpu.matmul %9, %10, %cst_7 {dimension_numbers = #tpu.dot_dimension_numbers<[1], [0], [0], [1], [0, 0, 1, 1], [], []>} : vector<16x32xbf16>, vector<32x32xbf16>, vector<16x32xf32> -> vector<16x32xf32>
    %c0_8 = arith.constant 0 : index
    %c0_9 = arith.constant 0 : index
    %12 = vector.load %arg5[%c0_8, %c0_9] : memref<1x32xf32, #tpu.memory_space<vmem>>, vector<1x32xf32>
    %13 = vector.broadcast %12 : vector<1x32xf32> to vector<16x32xf32>
    %14 = arith.addf %11, %13 : vector<16x32xf32>
    %cst_10 = arith.constant 0.000000e+00 : f32
    %15 = vector.broadcast %cst_10 : f32 to vector<16x32xf32>
    %16 = arith.maximumf %14, %15 : vector<16x32xf32>
    %17 = arith.truncf %16 : vector<16x32xf32> to vector<16x32xbf16>
    %c0_11 = arith.constant 0 : index
    %c0_12 = arith.constant 0 : index
    %18 = vector.load %arg6[%c0_11, %c0_12] : memref<32x384xbf16, #tpu.memory_space<vmem>>, vector<32x384xbf16>
    %cst_13 = arith.constant dense<0.000000e+00> : vector<16x384xf32>
    %19 = tpu.matmul %17, %18, %cst_13 {dimension_numbers = #tpu.dot_dimension_numbers<[1], [0], [0], [1], [0, 0, 1, 1], [], []>} : vector<16x32xbf16>, vector<32x384xbf16>, vector<16x384xf32> -> vector<16x384xf32>
    %20 = arith.truncf %0 : vector<16x32xf32> to vector<16x32xbf16>
    %c0_14 = arith.constant 0 : index
    %c0_15 = arith.constant 0 : index
    %21 = vector.load %arg7[%c0_14, %c0_15] : memref<32x384xbf16, #tpu.memory_space<vmem>>, vector<32x384xbf16>
    %cst_16 = arith.constant dense<0.000000e+00> : vector<16x384xf32>
    %22 = tpu.matmul %20, %21, %cst_16 {dimension_numbers = #tpu.dot_dimension_numbers<[1], [0], [0], [1], [0, 0, 1, 1], [], []>} : vector<16x32xbf16>, vector<32x384xbf16>, vector<16x384xf32> -> vector<16x384xf32>
    %23 = arith.addf %19, %22 : vector<16x384xf32>
    %c0_17 = arith.constant 0 : index
    %c0_18 = arith.constant 0 : index
    %24 = vector.load %arg8[%c0_17, %c0_18] : memref<16x384xf32, #tpu.memory_space<vmem>>, vector<16x384xf32>
    tpu.vector_store %arg8[%c0_17, %c0_18], %23 {strides = array<i32>} : memref<16x384xf32, #tpu.memory_space<vmem>>, vector<16x384xf32>,
    return
  }
  func.func @transform_0(%arg0: i32) -> (i32, i32) {
    %c0_i32 = arith.constant 0 : i32
    %c0_i32_0 = arith.constant 0 : i32
    return %arg0, %c0_i32 : i32, i32
  }
  func.func @transform_1(%arg0: i32) -> (i32, i32) {
    %c0_i32 = arith.constant 0 : i32
    %c0_i32_0 = arith.constant 0 : i32
    %c0_i32_1 = arith.constant 0 : i32
    return %c0_i32, %c0_i32_0 : i32, i32
  }
  func.func @transform_2(%arg0: i32) -> (i32, i32) {
    %c0_i32 = arith.constant 0 : i32
    %c0_i32_0 = arith.constant 0 : i32
    %c0_i32_1 = arith.constant 0 : i32
    return %c0_i32, %c0_i32_0 : i32, i32
  }
  func.func @transform_3(%arg0: i32) -> (i32, i32) {
    %c0_i32 = arith.constant 0 : i32
    %c0_i32_0 = arith.constant 0 : i32
    %c0_i32_1 = arith.constant 0 : i32
    return %c0_i32, %c0_i32_0 : i32, i32
  }
  func.func @transform_4(%arg0: i32) -> (i32, i32) {
    %c0_i32 = arith.constant 0 : i32
    %c0_i32_0 = arith.constant 0 : i32
    %c0_i32_1 = arith.constant 0 : i32
    return %c0_i32, %c0_i32_0 : i32, i32
  }
  func.func @transform_5(%arg0: i32) -> (i32, i32) {
    %c0_i32 = arith.constant 0 : i32
    %c0_i32_0 = arith.constant 0 : i32
    %c0_i32_1 = arith.constant 0 : i32
    return %c0_i32, %c0_i32_0 : i32, i32
  }
  func.func @transform_6(%arg0: i32) -> (i32, i32) {
    %c0_i32 = arith.constant 0 : i32
    %c0_i32_0 = arith.constant 0 : i32
    %c0_i32_1 = arith.constant 0 : i32
    return %c0_i32, %c0_i32_0 : i32, i32
  }
  func.func @transform_7(%arg0: i32) -> (i32, i32) {
    %c0_i32 = arith.constant 0 : i32
    %c0_i32_0 = arith.constant 0 : i32
    return %arg0, %c0_i32 : i32, i32
  }
}

module attributes {stable_mosaic.version = 11 : i64} {
  func.func @_res_block_kernel(%arg0: i32, %arg1: memref<64x24xf32, #tpu.memory_space<vmem>>, %arg2: memref<1x24xf32, #tpu.memory_space<vmem>>, %arg3: memref<1x24xf32, #tpu.memory_space<vmem>>, %arg4: memref<24x24xbf16, #tpu.memory_space<vmem>>, %arg5: memref<1x24xf32, #tpu.memory_space<vmem>>, %arg6: memref<24x256xbf16, #tpu.memory_space<vmem>>, %arg7: memref<24x256xbf16, #tpu.memory_space<vmem>>, %arg8: memref<64x256xf32, #tpu.memory_space<vmem>>) attributes {dimension_semantics = [#tpu.dimension_semantics<parallel>], iteration_bounds = array<i64: 2>, scalar_prefetch = 0 : i64, scratch_operands = 0 : i64, tpu.core_type = #tpu.core_type<tc>, window_params = [{transform_indices = @transform_0, window_bounds = array<i64: 64, 24>}, {pipeline_mode = #tpu.pipeline_mode<synchronous>, transform_indices = @transform_1, window_bounds = array<i64: 1, 24>}, {pipeline_mode = #tpu.pipeline_mode<synchronous>, transform_indices = @transform_2, window_bounds = array<i64: 1, 24>}, {pipeline_mode = #tpu.pipeline_mode<synchronous>, transform_indices = @transform_3, window_bounds = array<i64: 24, 24>}, {pipeline_mode = #tpu.pipeline_mode<synchronous>, transform_indices = @transform_4, window_bounds = array<i64: 1, 24>}, {pipeline_mode = #tpu.pipeline_mode<synchronous>, transform_indices = @transform_5, window_bounds = array<i64: 24, 256>}, {pipeline_mode = #tpu.pipeline_mode<synchronous>, transform_indices = @transform_6, window_bounds = array<i64: 24, 256>}, {transform_indices = @transform_7, window_bounds = array<i64: 64, 256>}]} {
    %c0 = arith.constant 0 : index
    %c0_0 = arith.constant 0 : index
    %0 = vector.load %arg1[%c0, %c0_0] : memref<64x24xf32, #tpu.memory_space<vmem>>, vector<64x24xf32>
    %c0_1 = arith.constant 0 : index
    %c0_2 = arith.constant 0 : index
    %1 = vector.load %arg2[%c0_1, %c0_2] : memref<1x24xf32, #tpu.memory_space<vmem>>, vector<1x24xf32>
    %2 = vector.broadcast %1 : vector<1x24xf32> to vector<64x24xf32>
    %3 = arith.mulf %0, %2 : vector<64x24xf32>
    %c0_3 = arith.constant 0 : index
    %c0_4 = arith.constant 0 : index
    %4 = vector.load %arg3[%c0_3, %c0_4] : memref<1x24xf32, #tpu.memory_space<vmem>>, vector<1x24xf32>
    %5 = vector.broadcast %4 : vector<1x24xf32> to vector<64x24xf32>
    %6 = arith.addf %3, %5 : vector<64x24xf32>
    %cst = arith.constant 0.000000e+00 : f32
    %7 = vector.broadcast %cst : f32 to vector<64x24xf32>
    %8 = arith.maximumf %6, %7 : vector<64x24xf32>
    %9 = arith.truncf %8 : vector<64x24xf32> to vector<64x24xbf16>
    %c0_5 = arith.constant 0 : index
    %c0_6 = arith.constant 0 : index
    %10 = vector.load %arg4[%c0_5, %c0_6] : memref<24x24xbf16, #tpu.memory_space<vmem>>, vector<24x24xbf16>
    %cst_7 = arith.constant dense<0.000000e+00> : vector<64x24xf32>
    %11 = tpu.matmul %9, %10, %cst_7 {dimension_numbers = #tpu.dot_dimension_numbers<[1], [0], [0], [1], [0, 0, 1, 1], [], []>} : vector<64x24xbf16>, vector<24x24xbf16>, vector<64x24xf32> -> vector<64x24xf32>
    %c0_8 = arith.constant 0 : index
    %c0_9 = arith.constant 0 : index
    %12 = vector.load %arg5[%c0_8, %c0_9] : memref<1x24xf32, #tpu.memory_space<vmem>>, vector<1x24xf32>
    %13 = vector.broadcast %12 : vector<1x24xf32> to vector<64x24xf32>
    %14 = arith.addf %11, %13 : vector<64x24xf32>
    %cst_10 = arith.constant 0.000000e+00 : f32
    %15 = vector.broadcast %cst_10 : f32 to vector<64x24xf32>
    %16 = arith.maximumf %14, %15 : vector<64x24xf32>
    %17 = arith.truncf %16 : vector<64x24xf32> to vector<64x24xbf16>
    %c0_11 = arith.constant 0 : index
    %c0_12 = arith.constant 0 : index
    %18 = vector.load %arg6[%c0_11, %c0_12] : memref<24x256xbf16, #tpu.memory_space<vmem>>, vector<24x256xbf16>
    %cst_13 = arith.constant dense<0.000000e+00> : vector<64x256xf32>
    %19 = tpu.matmul %17, %18, %cst_13 {dimension_numbers = #tpu.dot_dimension_numbers<[1], [0], [0], [1], [0, 0, 1, 1], [], []>} : vector<64x24xbf16>, vector<24x256xbf16>, vector<64x256xf32> -> vector<64x256xf32>
    %20 = arith.truncf %0 : vector<64x24xf32> to vector<64x24xbf16>
    %c0_14 = arith.constant 0 : index
    %c0_15 = arith.constant 0 : index
    %21 = vector.load %arg7[%c0_14, %c0_15] : memref<24x256xbf16, #tpu.memory_space<vmem>>, vector<24x256xbf16>
    %cst_16 = arith.constant dense<0.000000e+00> : vector<64x256xf32>
    %22 = tpu.matmul %20, %21, %cst_16 {dimension_numbers = #tpu.dot_dimension_numbers<[1], [0], [0], [1], [0, 0, 1, 1], [], []>} : vector<64x24xbf16>, vector<24x256xbf16>, vector<64x256xf32> -> vector<64x256xf32>
    %23 = arith.addf %19, %22 : vector<64x256xf32>
    %c0_17 = arith.constant 0 : index
    %c0_18 = arith.constant 0 : index
    %24 = vector.load %arg8[%c0_17, %c0_18] : memref<64x256xf32, #tpu.memory_space<vmem>>, vector<64x256xf32>
    tpu.vector_store %arg8[%c0_17, %c0_18], %23 {strides = array<i32>} : memref<64x256xf32, #tpu.memory_space<vmem>>, vector<64x256xf32>,
    return
  }
  func.func @transform_0(%arg0: i32) -> (i32, i32) {
    %c0_i32 = arith.constant 0 : i32
    %c0_i32_0 = arith.constant 0 : i32
    return %arg0, %c0_i32 : i32, i32
  }
  func.func @transform_1(%arg0: i32) -> (i32, i32) {
    %c0_i32 = arith.constant 0 : i32
    %c0_i32_0 = arith.constant 0 : i32
    %c0_i32_1 = arith.constant 0 : i32
    return %c0_i32, %c0_i32_0 : i32, i32
  }
  func.func @transform_2(%arg0: i32) -> (i32, i32) {
    %c0_i32 = arith.constant 0 : i32
    %c0_i32_0 = arith.constant 0 : i32
    %c0_i32_1 = arith.constant 0 : i32
    return %c0_i32, %c0_i32_0 : i32, i32
  }
  func.func @transform_3(%arg0: i32) -> (i32, i32) {
    %c0_i32 = arith.constant 0 : i32
    %c0_i32_0 = arith.constant 0 : i32
    %c0_i32_1 = arith.constant 0 : i32
    return %c0_i32, %c0_i32_0 : i32, i32
  }
  func.func @transform_4(%arg0: i32) -> (i32, i32) {
    %c0_i32 = arith.constant 0 : i32
    %c0_i32_0 = arith.constant 0 : i32
    %c0_i32_1 = arith.constant 0 : i32
    return %c0_i32, %c0_i32_0 : i32, i32
  }
  func.func @transform_5(%arg0: i32) -> (i32, i32) {
    %c0_i32 = arith.constant 0 : i32
    %c0_i32_0 = arith.constant 0 : i32
    %c0_i32_1 = arith.constant 0 : i32
    return %c0_i32, %c0_i32_0 : i32, i32
  }
  func.func @transform_6(%arg0: i32) -> (i32, i32) {
    %c0_i32 = arith.constant 0 : i32
    %c0_i32_0 = arith.constant 0 : i32
    %c0_i32_1 = arith.constant 0 : i32
    return %c0_i32, %c0_i32_0 : i32, i32
  }
  func.func @transform_7(%arg0: i32) -> (i32, i32) {
    %c0_i32 = arith.constant 0 : i32
    %c0_i32_0 = arith.constant 0 : i32
    return %arg0, %c0_i32 : i32, i32
  }
}

module attributes {stable_mosaic.version = 11 : i64} {
  func.func @_res_block_kernel(%arg0: i32, %arg1: memref<256x16xf32, #tpu.memory_space<vmem>>, %arg2: memref<1x16xf32, #tpu.memory_space<vmem>>, %arg3: memref<1x16xf32, #tpu.memory_space<vmem>>, %arg4: memref<16x16xbf16, #tpu.memory_space<vmem>>, %arg5: memref<1x16xf32, #tpu.memory_space<vmem>>, %arg6: memref<16x128xbf16, #tpu.memory_space<vmem>>, %arg7: memref<16x128xbf16, #tpu.memory_space<vmem>>, %arg8: memref<256x128xf32, #tpu.memory_space<vmem>>) attributes {dimension_semantics = [#tpu.dimension_semantics<parallel>], iteration_bounds = array<i64: 2>, scalar_prefetch = 0 : i64, scratch_operands = 0 : i64, tpu.core_type = #tpu.core_type<tc>, window_params = [{transform_indices = @transform_0, window_bounds = array<i64: 256, 16>}, {pipeline_mode = #tpu.pipeline_mode<synchronous>, transform_indices = @transform_1, window_bounds = array<i64: 1, 16>}, {pipeline_mode = #tpu.pipeline_mode<synchronous>, transform_indices = @transform_2, window_bounds = array<i64: 1, 16>}, {pipeline_mode = #tpu.pipeline_mode<synchronous>, transform_indices = @transform_3, window_bounds = array<i64: 16, 16>}, {pipeline_mode = #tpu.pipeline_mode<synchronous>, transform_indices = @transform_4, window_bounds = array<i64: 1, 16>}, {pipeline_mode = #tpu.pipeline_mode<synchronous>, transform_indices = @transform_5, window_bounds = array<i64: 16, 128>}, {pipeline_mode = #tpu.pipeline_mode<synchronous>, transform_indices = @transform_6, window_bounds = array<i64: 16, 128>}, {transform_indices = @transform_7, window_bounds = array<i64: 256, 128>}]} {
    %c0 = arith.constant 0 : index
    %c0_0 = arith.constant 0 : index
    %0 = vector.load %arg1[%c0, %c0_0] : memref<256x16xf32, #tpu.memory_space<vmem>>, vector<256x16xf32>
    %c0_1 = arith.constant 0 : index
    %c0_2 = arith.constant 0 : index
    %1 = vector.load %arg2[%c0_1, %c0_2] : memref<1x16xf32, #tpu.memory_space<vmem>>, vector<1x16xf32>
    %2 = vector.broadcast %1 : vector<1x16xf32> to vector<256x16xf32>
    %3 = arith.mulf %0, %2 : vector<256x16xf32>
    %c0_3 = arith.constant 0 : index
    %c0_4 = arith.constant 0 : index
    %4 = vector.load %arg3[%c0_3, %c0_4] : memref<1x16xf32, #tpu.memory_space<vmem>>, vector<1x16xf32>
    %5 = vector.broadcast %4 : vector<1x16xf32> to vector<256x16xf32>
    %6 = arith.addf %3, %5 : vector<256x16xf32>
    %cst = arith.constant 0.000000e+00 : f32
    %7 = vector.broadcast %cst : f32 to vector<256x16xf32>
    %8 = arith.maximumf %6, %7 : vector<256x16xf32>
    %9 = arith.truncf %8 : vector<256x16xf32> to vector<256x16xbf16>
    %c0_5 = arith.constant 0 : index
    %c0_6 = arith.constant 0 : index
    %10 = vector.load %arg4[%c0_5, %c0_6] : memref<16x16xbf16, #tpu.memory_space<vmem>>, vector<16x16xbf16>
    %cst_7 = arith.constant dense<0.000000e+00> : vector<256x16xf32>
    %11 = tpu.matmul %9, %10, %cst_7 {dimension_numbers = #tpu.dot_dimension_numbers<[1], [0], [0], [1], [0, 0, 1, 1], [], []>} : vector<256x16xbf16>, vector<16x16xbf16>, vector<256x16xf32> -> vector<256x16xf32>
    %c0_8 = arith.constant 0 : index
    %c0_9 = arith.constant 0 : index
    %12 = vector.load %arg5[%c0_8, %c0_9] : memref<1x16xf32, #tpu.memory_space<vmem>>, vector<1x16xf32>
    %13 = vector.broadcast %12 : vector<1x16xf32> to vector<256x16xf32>
    %14 = arith.addf %11, %13 : vector<256x16xf32>
    %cst_10 = arith.constant 0.000000e+00 : f32
    %15 = vector.broadcast %cst_10 : f32 to vector<256x16xf32>
    %16 = arith.maximumf %14, %15 : vector<256x16xf32>
    %17 = arith.truncf %16 : vector<256x16xf32> to vector<256x16xbf16>
    %c0_11 = arith.constant 0 : index
    %c0_12 = arith.constant 0 : index
    %18 = vector.load %arg6[%c0_11, %c0_12] : memref<16x128xbf16, #tpu.memory_space<vmem>>, vector<16x128xbf16>
    %cst_13 = arith.constant dense<0.000000e+00> : vector<256x128xf32>
    %19 = tpu.matmul %17, %18, %cst_13 {dimension_numbers = #tpu.dot_dimension_numbers<[1], [0], [0], [1], [0, 0, 1, 1], [], []>} : vector<256x16xbf16>, vector<16x128xbf16>, vector<256x128xf32> -> vector<256x128xf32>
    %20 = arith.truncf %0 : vector<256x16xf32> to vector<256x16xbf16>
    %c0_14 = arith.constant 0 : index
    %c0_15 = arith.constant 0 : index
    %21 = vector.load %arg7[%c0_14, %c0_15] : memref<16x128xbf16, #tpu.memory_space<vmem>>, vector<16x128xbf16>
    %cst_16 = arith.constant dense<0.000000e+00> : vector<256x128xf32>
    %22 = tpu.matmul %20, %21, %cst_16 {dimension_numbers = #tpu.dot_dimension_numbers<[1], [0], [0], [1], [0, 0, 1, 1], [], []>} : vector<256x16xbf16>, vector<16x128xbf16>, vector<256x128xf32> -> vector<256x128xf32>
    %23 = arith.addf %19, %22 : vector<256x128xf32>
    %c0_17 = arith.constant 0 : index
    %c0_18 = arith.constant 0 : index
    %24 = vector.load %arg8[%c0_17, %c0_18] : memref<256x128xf32, #tpu.memory_space<vmem>>, vector<256x128xf32>
    tpu.vector_store %arg8[%c0_17, %c0_18], %23 {strides = array<i32>} : memref<256x128xf32, #tpu.memory_space<vmem>>, vector<256x128xf32>,
    return
  }
  func.func @transform_0(%arg0: i32) -> (i32, i32) {
    %c0_i32 = arith.constant 0 : i32
    %c0_i32_0 = arith.constant 0 : i32
    return %arg0, %c0_i32 : i32, i32
  }
  func.func @transform_1(%arg0: i32) -> (i32, i32) {
    %c0_i32 = arith.constant 0 : i32
    %c0_i32_0 = arith.constant 0 : i32
    %c0_i32_1 = arith.constant 0 : i32
    return %c0_i32, %c0_i32_0 : i32, i32
  }
  func.func @transform_2(%arg0: i32) -> (i32, i32) {
    %c0_i32 = arith.constant 0 : i32
    %c0_i32_0 = arith.constant 0 : i32
    %c0_i32_1 = arith.constant 0 : i32
    return %c0_i32, %c0_i32_0 : i32, i32
  }
  func.func @transform_3(%arg0: i32) -> (i32, i32) {
    %c0_i32 = arith.constant 0 : i32
    %c0_i32_0 = arith.constant 0 : i32
    %c0_i32_1 = arith.constant 0 : i32
    return %c0_i32, %c0_i32_0 : i32, i32
  }
  func.func @transform_4(%arg0: i32) -> (i32, i32) {
    %c0_i32 = arith.constant 0 : i32
    %c0_i32_0 = arith.constant 0 : i32
    %c0_i32_1 = arith.constant 0 : i32
    return %c0_i32, %c0_i32_0 : i32, i32
  }
  func.func @transform_5(%arg0: i32) -> (i32, i32) {
    %c0_i32 = arith.constant 0 : i32
    %c0_i32_0 = arith.constant 0 : i32
    %c0_i32_1 = arith.constant 0 : i32
    return %c0_i32, %c0_i32_0 : i32, i32
  }
  func.func @transform_6(%arg0: i32) -> (i32, i32) {
    %c0_i32 = arith.constant 0 : i32
    %c0_i32_0 = arith.constant 0 : i32
    %c0_i32_1 = arith.constant 0 : i32
    return %c0_i32, %c0_i32_0 : i32, i32
  }
  func.func @transform_7(%arg0: i32) -> (i32, i32) {
    %c0_i32 = arith.constant 0 : i32
    %c0_i32_0 = arith.constant 0 : i32
    return %arg0, %c0_i32 : i32, i32
  }
}

module attributes {stable_mosaic.version = 11 : i64} {
  func.func @_matmul_kernel(%arg0: i32, %arg1: memref<512x8xf32, #tpu.memory_space<vmem>>, %arg2: memref<8x128xbf16, #tpu.memory_space<vmem>>, %arg3: memref<512x128xf32, #tpu.memory_space<vmem>>) attributes {dimension_semantics = [#tpu.dimension_semantics<parallel>], iteration_bounds = array<i64: 4>, scalar_prefetch = 0 : i64, scratch_operands = 0 : i64, tpu.core_type = #tpu.core_type<tc>, window_params = [{transform_indices = @transform_0, window_bounds = array<i64: 512, 8>}, {pipeline_mode = #tpu.pipeline_mode<synchronous>, transform_indices = @transform_1, window_bounds = array<i64: 8, 128>}, {transform_indices = @transform_2, window_bounds = array<i64: 512, 128>}]} {
    %c0 = arith.constant 0 : index
    %c0_0 = arith.constant 0 : index
    %0 = vector.load %arg1[%c0, %c0_0] : memref<512x8xf32, #tpu.memory_space<vmem>>, vector<512x8xf32>
    %1 = arith.truncf %0 : vector<512x8xf32> to vector<512x8xbf16>
    %c0_1 = arith.constant 0 : index
    %c0_2 = arith.constant 0 : index
    %2 = vector.load %arg2[%c0_1, %c0_2] : memref<8x128xbf16, #tpu.memory_space<vmem>>, vector<8x128xbf16>
    %cst = arith.constant dense<0.000000e+00> : vector<512x128xf32>
    %3 = tpu.matmul %1, %2, %cst {dimension_numbers = #tpu.dot_dimension_numbers<[1], [0], [0], [1], [0, 0, 1, 1], [], []>} : vector<512x8xbf16>, vector<8x128xbf16>, vector<512x128xf32> -> vector<512x128xf32>
    %c0_3 = arith.constant 0 : index
    %c0_4 = arith.constant 0 : index
    %4 = vector.load %arg3[%c0_3, %c0_4] : memref<512x128xf32, #tpu.memory_space<vmem>>, vector<512x128xf32>
    tpu.vector_store %arg3[%c0_3, %c0_4], %3 {strides = array<i32>} : memref<512x128xf32, #tpu.memory_space<vmem>>, vector<512x128xf32>,
    return
  }
  func.func @transform_0(%arg0: i32) -> (i32, i32) {
    %c0_i32 = arith.constant 0 : i32
    %c0_i32_0 = arith.constant 0 : i32
    return %arg0, %c0_i32 : i32, i32
  }
  func.func @transform_1(%arg0: i32) -> (i32, i32) {
    %c0_i32 = arith.constant 0 : i32
    %c0_i32_0 = arith.constant 0 : i32
    %c0_i32_1 = arith.constant 0 : i32
    return %c0_i32, %c0_i32_0 : i32, i32
  }
  func.func @transform_2(%arg0: i32) -> (i32, i32) {
    %c0_i32 = arith.constant 0 : i32
    %c0_i32_0 = arith.constant 0 : i32
    return %arg0, %c0_i32 : i32, i32
  }
}

</mosaic_0001>

<bundles_post_ra>
// kernel: forward.5
= control target key start
LH: loop header
LB: loop body
LE: loop exit
PB: predicated region body
PF: predicated region fallthrough
CT: control target
= control target key end

     0   :  { %12 = vsyncpa [#allocation3], 0  ;;  %s1002_s0 = inlined_call_operand.hbm [shape: f32[2,40], index: 0, kind: input, shape index: {}]   ;;  %s1003_s1 = inlined_call_operand.hbm [shape: f32[1,40], index: 1, kind: input, shape index: {}]   ;;  %s1004_s2 = inlined_call_operand.hbm [shape: f32[1,40], index: 2, kind: input, shape index: {}]   ;;  %s1005_s3 = inlined_call_operand.hbm [shape: bf16[40,40], index: 3, kind: input, shape index: {}]   ;;  %s1006_s4 = inlined_call_operand.hbm [shape: f32[1,40], index: 4, kind: input, shape index: {}]   ;;  %s1007_s5 = inlined_call_operand.hbm [shape: bf16[40,512], index: 5, kind: input, shape index: {}]   ;;  %s1008_s6 = inlined_call_operand.hbm [shape: bf16[40,512], index: 6, kind: input, shape index: {}]   ;;  %s1009_s7 = inlined_call_operand.vmem [shape: f32[2,512], index: 7, kind: output, shape index: {}]  }
   0x1   :  { %13 = vsyncpa [#allocation5], 0 }
   0x2   :  { %14 = vsyncpa [#allocation8], 0 }
   0x3   :  { %15 = vsyncpa [#allocation11], 0  ;;  %s829_s24 = smov [#allocation4]   ;;  %s830_s26 = smov [#allocation7]  }
   0x4   :  { %s32_s25 = sshll.u32 %s829_s24, 4  ;;  %s51_s27 = sshll.u32 %s830_s26, 4  ;;  %s33_s25 = int_to_ptr.vmem [resolvable:$true] %s32_s25  ;;  %s884_s27 = int_to_ptr.vmem [resolvable:$true] %s51_s27 }
   0x5   :  { %s667_s30 = scalar_lea.hbm %s1003_s1, 16 }
   0x6   :  { %p668_p0 = scmp.ne.s32.totalorder %s1003_s1, %s667_s30  ;;  %p671_p1 = scmp.lt.u32.totalorder %s667_s30, %s1003_s1 }
   0x8   :  { %p673_p2 = pnand %p671_p1, %p668_p0 }
   0xa   :  { %676 = shalt.err (!%p673_p2)
}
   0xb   :  { %s677_s12 = scalar_lea.vmem %s33_s25, 16  ;;  %s681_s13 = scalar_lea.vmem %s33_s25, 32 }
   0xc   :  { %p678_p3 = scmp.ne.s32.totalorder %s33_s25, %s677_s12  ;;  %p682_p4 = scmp.lt.s32.totalorder %s33_s25, %s33_s25 }
   0xd   :  { %p683_p5 = scmp.lt.s32.totalorder %s681_s13, %s677_s12 }
   0xf   :  { %p684_p6 = por %p683_p5, %p682_p4 }
  0x11   :  { %p685_p7 = pnand %p684_p6, %p678_p3 }
  0x13   :  { %688 = shalt.err (!%p685_p7)
}
  0x14   :  { %35 = dma.hbm_to_vmem [thread:$0]  %s1003_s1, 16, %s33_s25, [#allocation5]  }
  0x15   :  { %s689_s18 = scalar_lea.hbm %s1005_s3, 320 }
  0x16   :  { %p690_p8 = scmp.ne.s32.totalorder %s1005_s3, %s689_s18  ;;  %p693_p9 = scmp.lt.u32.totalorder %s689_s18, %s1005_s3 }
  0x18   :  { %p695_p10 = pnand %p693_p9, %p690_p8 }
  0x1a   :  { %698 = shalt.err (!%p695_p10)
}
  0x1b   :  { %s699_s23 = scalar_lea.vmem %s884_s27, 320  ;;  %p704_p12 = scmp.lt.s32.totalorder %s884_s27, %s884_s27 }
  0x1c   :  { %p700_p11 = scmp.ne.s32.totalorder %s884_s27, %s699_s23  ;;  %p705_p13 = scmp.lt.s32.totalorder %s699_s23, %s699_s23 }
  0x1e   :  { %p706_p0 = por %p705_p13, %p704_p12 }
  0x20   :  { %p707_p1 = pnand %p706_p0, %p700_p11 }
  0x22   :  { %710 = shalt.err (!%p707_p1)
}
  0x23   :  { %s831_s1 = smov 64   ;;  %s832_s24 = smov 4  }
  0x24   :  { %57 = dma.hbm_to_vmem [thread:$0]  %s1005_s3, 320, %s884_s27, [#allocation8], %s831_s1, %s831_s1, %s832_s24  }
  0x25   :  { %s833_s28 = smov [#allocation10]   ;;  %s711_s9 = scalar_lea.hbm %s1007_s5, 1280 }
  0x26   :  { %s73_s29 = sshll.u32 %s833_s28, 4  ;;  %p712_p2 = scmp.ne.s32.totalorder %s1007_s5, %s711_s9  ;;  %s74_s29 = int_to_ptr.vmem [resolvable:$true] %s73_s29 }
  0x27   :  { %p715_p3 = scmp.lt.u32.totalorder %s711_s9, %s1007_s5 }
  0x29   :  { %p717_p4 = pnand %p715_p3, %p712_p2 }
  0x2b   :  { %720 = shalt.err (!%p717_p4)
}
  0x2c   :  { %s721_s14 = scalar_lea.vmem %s74_s29, 1280  ;;  %p726_p6 = scmp.lt.s32.totalorder %s74_s29, %s74_s29 }
  0x2d   :  { %p722_p5 = scmp.ne.s32.totalorder %s74_s29, %s721_s14  ;;  %p727_p7 = scmp.lt.s32.totalorder %s721_s14, %s721_s14 }
  0x2f   :  { %p728_p8 = por %p727_p7, %p726_p6 }
  0x31   :  { %p729_p9 = pnand %p728_p8, %p722_p5 }
  0x33   :  { %732 = shalt.err (!%p729_p9)
}
  0x34   :  { %s834_s3 = smov 256   ;;  %s835_s27 = smov 16  }
  0x35   :  { %79 = dma.hbm_to_vmem [thread:$0]  %s1007_s5, 1280, %s74_s29, [#allocation11], %s834_s3, %s834_s3, %s835_s27  }
  0x36   :  { %s836_s17 = smov [#allocation2]   ;;  %s837_s19 = smov [#allocation6]  }
  0x37   :  { %s22_s18 = sshll.u32 %s836_s17, 4  ;;  %s42_s20 = sshll.u32 %s837_s19, 4  ;;  %s23_s18 = int_to_ptr.vmem [resolvable:$true] %s22_s18  ;;  %s43_s20 = int_to_ptr.vmem [resolvable:$true] %s42_s20 }
  0x38   :  { %s733_s23 = scalar_lea.hbm %s1002_s0, 32 }
  0x39   :  { %p734_p10 = scmp.ne.s32.totalorder %s1002_s0, %s733_s23  ;;  %p737_p11 = scmp.lt.u32.totalorder %s733_s23, %s1002_s0 }
  0x3b   :  { %p739_p12 = pnand %p737_p11, %p734_p10 }
  0x3d   :  { %742 = shalt.err (!%p739_p12)
}
  0x3e   :  { %s743_s5 = scalar_lea.vmem %s23_s18, 32  ;;  %p748_p0 = scmp.lt.s32.totalorder %s23_s18, %s23_s18 }
  0x3f   :  { %p744_p13 = scmp.ne.s32.totalorder %s23_s18, %s743_s5  ;;  %p749_p1 = scmp.lt.s32.totalorder %s743_s5, %s743_s5 }
  0x41   :  { %p750_p2 = por %p749_p1, %p748_p0 }
  0x43   :  { %p751_p3 = pnand %p750_p2, %p744_p13 }
  0x45   :  { %754 = shalt.err (!%p751_p3)
}
  0x46   :  { %25 = dma.hbm_to_vmem [thread:$0]  %s1002_s0, 32, %s23_s18, [#allocation3]  }
  0x47   :  { %s755_s9 = scalar_lea.hbm %s1004_s2, 16 }
  0x48   :  { %p756_p4 = scmp.ne.s32.totalorder %s1004_s2, %s755_s9  ;;  %p759_p5 = scmp.lt.u32.totalorder %s755_s9, %s1004_s2 }
  0x4a   :  { %p761_p6 = pnand %p759_p5, %p756_p4 }
  0x4c   :  { %764 = shalt.err (!%p761_p6)
}
  0x4d   :  { %s765_s14 = scalar_lea.vmem %s43_s20, 16  ;;  %s769_s15 = scalar_lea.vmem %s43_s20, 32 }
  0x4e   :  { %p766_p7 = scmp.ne.s32.totalorder %s43_s20, %s765_s14  ;;  %p770_p8 = scmp.lt.s32.totalorder %s43_s20, %s43_s20 }
  0x4f   :  { %p771_p9 = scmp.lt.s32.totalorder %s769_s15, %s765_s14 }
  0x51   :  { %p772_p10 = por %p771_p9, %p770_p8 }
  0x53   :  { %p773_p11 = pnand %p772_p10, %p766_p7 }
  0x55   :  { %776 = shalt.err (!%p773_p11)
}
  0x56   :  { %45 = dma.hbm_to_vmem [thread:$0]  %s1004_s2, 16, %s43_s20, [#allocation5]  }
  0x57   :  { %s838_s17 = smov [#allocation9]   ;;  %s839_s19 = smov [#allocation12]  }
  0x58   :  { %s64_s18 = sshll.u32 %s838_s17, 4  ;;  %s85_s21 = sshll.u32 %s839_s19, 4  ;;  %s65_s18 = int_to_ptr.vmem [resolvable:$true] %s64_s18  ;;  %s86_s21 = int_to_ptr.vmem [resolvable:$true] %s85_s21 }
  0x59   :  { %s777_s1 = scalar_lea.hbm %s1006_s4, 16 }
  0x5a   :  { %p778_p12 = scmp.ne.s32.totalorder %s1006_s4, %s777_s1  ;;  %p781_p13 = scmp.lt.u32.totalorder %s777_s1, %s1006_s4 }
  0x5c   :  { %p783_p0 = pnand %p781_p13, %p778_p12 }
  0x5e   :  { %786 = shalt.err (!%p783_p0)
}
  0x5f   :  { %s787_s2 = scalar_lea.vmem %s65_s18, 16  ;;  %s791_s20 = scalar_lea.vmem %s65_s18, 32 }
  0x60   :  { %p788_p1 = scmp.ne.s32.totalorder %s65_s18, %s787_s2  ;;  %p792_p2 = scmp.lt.s32.totalorder %s65_s18, %s65_s18 }
  0x61   :  { %p793_p3 = scmp.lt.s32.totalorder %s791_s20, %s787_s2 }
  0x63   :  { %p794_p4 = por %p793_p3, %p792_p2 }
  0x65   :  { %p795_p5 = pnand %p794_p4, %p788_p1 }
  0x67   :  { %798 = shalt.err (!%p795_p5)
}
  0x68   :  { %67 = dma.hbm_to_vmem [thread:$0]  %s1006_s4, 16, %s65_s18, [#allocation8]  }
  0x69   :  { %s799_s9 = scalar_lea.hbm %s1008_s6, 1280 }
  0x6a   :  { %p800_p6 = scmp.ne.s32.totalorder %s1008_s6, %s799_s9  ;;  %p803_p7 = scmp.lt.u32.totalorder %s799_s9, %s1008_s6 }
  0x6c   :  { %p805_p8 = pnand %p803_p7, %p800_p6 }
  0x6e   :  { %808 = shalt.err (!%p805_p8)
}
  0x6f   :  { %s809_s14 = scalar_lea.vmem %s86_s21, 1280  ;;  %p814_p10 = scmp.lt.s32.totalorder %s86_s21, %s86_s21 }
  0x70   :  { %p810_p9 = scmp.ne.s32.totalorder %s86_s21, %s809_s14  ;;  %p815_p11 = scmp.lt.s32.totalorder %s809_s14, %s809_s14 }
  0x72   :  { %p816_p12 = por %p815_p11, %p814_p10 }
  0x74   :  { %p817_p13 = pnand %p816_p12, %p810_p9 }
  0x76   :  { %820 = shalt.err (!%p817_p13)
}
  0x77   :  { %91 = dma.hbm_to_vmem [thread:$0]  %s1008_s6, 1280, %s86_s21, [#allocation11], %s834_s3, %s834_s3, %s835_s27  }
  0x78   :  { %821 = dma.done.wait [#allocation3], 32  }
  0x79   :  { %822 = vsyncadd [#allocation3], 4294967264 }
  0x7a   :  { %823 = dma.done.wait [#allocation5], 32  }
  0x7b   :  { %824 = vsyncadd [#allocation5], 4294967264 }
  0x7c   :  { %825 = dma.done.wait [#allocation8], 336  }
  0x7d   :  { %826 = vsyncadd [#allocation8], 4294966960 }
  0x7e   :  { %827 = dma.done.wait [#allocation11], 2560  }
  0x7f   :  { %828 = vsyncadd [#allocation11], 4294964736  ;;  %v840_v0 = vmov 0.0   ;;  %vm841_vm0 = vmmov 0   ;;  %v842_v1 = vmov 0   ;;  %v632_v2 = vld [vmem:[#allocation7] sm:$0xff]   ;;  %v534_v56 = vlaneseq }
  0x80   :  { %599 = vmatprep.subr.bf16.mxu0 %v840_v0  ;;  %605 = vmatprep.mubr.msk.bf16.mxu0 %vm841_vm0, %v840_v0  ;;  %v633_v3 = vld [vmem:[#allocation7 + $0x8] sm:$0xff]   ;;  %v634_v4 = vld [vmem:[#allocation7 + $0x10] ss:$0 sps:$4 sm:$0xff]   ;;  %v114_v5 = vld [vmem:[#allocation2] sm:$0x3]  ;;  %vm164_vm1 = vcmask 1043456  }
  0x81   :  { %328 = vmatprep.mubr.bf16.mxu1 %v842_v1  ;;  %600 = vmatpush3.bf16.msra.mxu0 %v632_v2  ;;  %v556_v6 = vld [vmem:[#allocation4] ss:$0 sm:$0xff]  ;;  %v557_v7 = vld [vmem:[#allocation6] ss:$0 sm:$0xff]  ;;  %v639_v10 = vld [vmem:[#allocation12 + $0xc] ss:$16 sps:$4 sm:$0xff]   ;;  %v220_v29 = vpack.c.bf16 %v114_v5, %v114_v5 }
  0x82   :  { %601 = vmatprep.subr.bf16.mxu0 %v840_v0  ;;  %v122_v8 = vmul.f32 %v556_v6, %v114_v5  ;;  %v635_v9 = vld [vmem:[#allocation12 + $0x4] ss:$16 sps:$4 sm:$0xff]   ;;  %v640_v12 = vld [vmem:[#allocation12] ss:$16 sps:$4 sm:$0xff]   ;;  %v166_v13 = vsel %vm164_vm1, %v634_v4, 0  ;;  %vm160_vm2 = vcmask 326656  }
  0x83   :  { %296 = vmatprep.subr.bf16.mxu1 %v635_v9  ;;  %v641_v14 = vld [vmem:[#allocation12 + $0x24] ss:$16 sps:$4 sm:$0xff]   ;;  %v646_v17 = vld [vmem:[#allocation12 + $0x20] ss:$16 sps:$4 sm:$0xff]   ;;  %v637_v21 = vld [vmem:[#allocation12 + $0x8] ss:$16 sps:$4 sm:$0xff]  }
  0x84   :  { %v130_v11 = vadd.f32 %v557_v7, %v122_v8  ;;  %297 = vmatpush1.bf16.msra.mxu1 %v640_v12  ;;  %v229_v16 = vld [vmem:[#allocation12 + $0x40] sm:$0xff]  ;;  %v645_v22 = vld [vmem:[#allocation12 + $0x2c] ss:$16 sps:$4 sm:$0xff]   ;;  %v643_v26 = vld [vmem:[#allocation12 + $0x28] ss:$16 sps:$4 sm:$0xff]   ;;  %v535_v58 = vshrl.u32 %v534_v56, 7 }
  0x85   :  { %602 = vmatpush3.bf16.msra.mxu0 %v633_v3  ;;  %298 = vmatprep.subr.bf16.mxu1 %v641_v14  ;;  %v572_v18 = vcombine.high %v229_v16, %v229_v16  ;;  %v571_v19 = vcombine.low %v229_v16, %v229_v16  ;;  %v230_v23 = vld [vmem:[#allocation12 + $0x48] sm:$0xff]  ;;  %v653_v25 = vld [vmem:[#allocation10 + $0x4] ss:$16 sps:$4 sm:$0xff]   ;;  %v651_v30 = vld [vmem:[#allocation10] ss:$16 sps:$4 sm:$0xff]  }
  0x86   :  { %603 = vmatprep.subr.bf16.mxu0 %v840_v0  ;;  %v131_v15 = vmax.f32 %v130_v11, 0.0  ;;  %v574_v27 = vcombine.high %v230_v23, %v230_v23  ;;  %v573_v28 = vcombine.low %v230_v23, %v230_v23  ;;  %v659_v31 = vld [vmem:[#allocation10 + $0x24] ss:$16 sps:$4 sm:$0xff]   ;;  %v656_v33 = vld [vmem:[#allocation10 + $0xc] ss:$16 sps:$4 sm:$0xff]  }
  0x87   :  { %v285_v24 = vsel %vm164_vm1, %v571_v19, 0  ;;  %v657_v34 = vld [vmem:[#allocation10 + $0x20] ss:$16 sps:$4 sm:$0xff]   ;;  %v654_v35 = vld [vmem:[#allocation10 + $0x8] ss:$16 sps:$4 sm:$0xff]  }
  0x88   :  { %v132_v20 = vpack.c.bf16 %v131_v15, %v131_v15  ;;  %299 = vmatpush1.bf16.msra.mxu1 %v646_v17  ;;  %v291_v32 = vsel %vm164_vm1, %v573_v28, 0  ;;  %v662_v36 = vld [vmem:[#allocation10 + $0x2c] ss:$16 sps:$4 sm:$0xff]   ;;  %v660_v37 = vld [vmem:[#allocation10 + $0x28] ss:$16 sps:$4 sm:$0xff]   ;;  %v218_v38 = vld [vmem:[#allocation10 + $0x40] sm:$0xff] }
  0x89   :  { %604 = vmatpush3.bf16.msra.mxu0 %v166_v13  ;;  %575 = vmatprep.subr.msk.bf16.mxu1 %vm164_vm1, %v572_v18  ;;  %v219_v39 = vld [vmem:[#allocation10 + $0x48] sm:$0xff]  ;;  %v588_v40 = vcombine.high %v218_v38, %v218_v38  ;;  %v587_v42 = vcombine.low %v218_v38, %v218_v38  ;;  %v558_v46 = vld [vmem:[#allocation9] ss:$0 sm:$0xff]  ;;  %v843_v54 = vmov 1983009808  }
  0x8a   :  { %337 = vmatprep.subr.bf16.mxu0 %v639_v10  ;;  %v590_v41 = vcombine.high %v219_v39, %v219_v39  ;;  %v589_v43 = vcombine.low %v219_v39, %v219_v39  ;;  %v532_v55 = vunpack.c.l.s4 %v843_v54 }
  0x8b   :  { %v432_v44 = vsel %vm164_vm1, %v587_v42, 0 }
  0x8c   :  { %606 = vmatmul.mubr.msk.bf16.vlgmr.msra.gmra.mrb[0].mxu0 %vm160_vm2, %v132_v20  ;;  %301 = vmatpush1.bf16.msra.mxu1 %v285_v24  ;;  %v438_v45 = vsel %vm164_vm1, %v589_v43, 0  ;;  %v533_v57 = vunpack.c.0.s8 %v532_v55 }
  0x8d   :  { %338 = vmatpush1.bf16.msra.mxu0 %v637_v21  ;;  %369 = vmatprep.mubr.bf16.mxu0 %v842_v1 }
  0x8e   :  { %339 = vmatprep.subr.bf16.mxu0 %v645_v22  ;;  %443 = vmatprep.subr.bf16.mxu1 %v653_v25  ;;  %v536_v61 = vsub.s32 %v533_v57, %v535_v58 }
  0x8f   :  { %576 = vmatmul.mubr.msk.bf16.vlgmr.msra.gmra.mrb[0].mxu1 %vm160_vm2, %v220_v29 }
  0x90   :  { %444 = vmatpush1.bf16.msra.mxu1 %v651_v30  ;;  %475 = vmatprep.mubr.bf16.mxu1 %v842_v1 }
  0x91   :  { %340 = vmatpush1.bf16.msra.mxu0 %v643_v26  ;;  %445 = vmatprep.subr.bf16.mxu1 %v659_v31 }
  0x92   :  { %577 = vmatprep.subr.msk.bf16.mxu0 %vm164_vm1, %v574_v27 }
  0x94   :  { %446 = vmatpush1.bf16.msra.mxu1 %v657_v34 }
  0x95   :  { %342 = vmatpush1.bf16.msra.mxu0 %v291_v32  ;;  %591 = vmatprep.subr.msk.bf16.mxu1 %vm164_vm1, %v588_v40 }
  0x96   :  { %484 = vmatprep.subr.bf16.mxu0 %v656_v33 }
  0x98   :  { %578 = vmatmul.mubr.msk.bf16.vlgmr.msra.gmra.mrb[4].mxu0 %vm160_vm2, %v220_v29  ;;  %448 = vmatpush1.bf16.msra.mxu1 %v432_v44 }
  0x99   :  { %485 = vmatpush1.bf16.msra.mxu0 %v654_v35  ;;  %516 = vmatprep.mubr.bf16.mxu0 %v842_v1 }
  0x9a   :  { %486 = vmatprep.subr.bf16.mxu0 %v662_v36 }
  0x9d   :  { %487 = vmatpush1.bf16.msra.mxu0 %v660_v37 }
  0x9e   :  { %593 = vmatprep.subr.msk.bf16.mxu0 %vm164_vm1, %v590_v41 }
  0xa1   :  { %489 = vmatpush1.bf16.msra.mxu0 %v438_v45 }
 0x15f   :  { %v202_v47 = vpop.f32.mrb[0].mxu0 }
 0x160   :  { %v203_v48 = vadd.f32 %v558_v46, %v202_v47  ;;  %v607_v49 = vpop.f32.mrb[1].mxu0 }
 0x161   :  { %v205_v50 = vpop.f32.mrb[2].mxu0 }
 0x162   :  { %v208_v51 = vmax.f32 %v203_v48, 0.0  ;;  %v608_v52 = vpop.f32.mrb[3].mxu0 }
 0x164   :  { %v209_v53 = vpack.c.bf16 %v208_v51, %v208_v51 }
 0x166   :  { %592 = vmatmul.mubr.msk.bf16.vlgmr.msra.gmra.mrb[0].mxu1 %vm160_vm2, %v209_v53  ;;  %594 = vmatmul.mubr.msk.bf16.vlgmr.msra.gmra.mrb[4].mxu0 %vm160_vm2, %v209_v53 }
 0x239   :  { %v477_v59 = vpop.f32.mrb[0].mxu1  ;;  %v518_v60 = vpop.f32.mrb[4].mxu0 }
 0x23a   :  { %v479_v62 = vpop.f32.mrb[1].mxu1  ;;  %v520_v63 = vpop.f32.mrb[5].mxu0 }
 0x23b   :  { %v529_v0 = vcombine.low %v477_v59, %v479_v62  ;;  %v530_v1 = vcombine.low %v518_v60, %v520_v63  ;;  %v481_v2 = vpop.f32.mrb[2].mxu1  ;;  %v522_v3 = vpop.f32.mrb[6].mxu0 }
 0x23c   :  { %v482_v4 = vpop.f32.mrb[3].mxu1  ;;  %v523_v5 = vpop.f32.mrb[7].mxu0 }
 0x23d   :  { %v537_v6 = vrot.slane %v529_v0, %v536_v61  ;;  %v544_v7 = vrot.slane %v530_v1, %v536_v61 }
 0x23f   :  { %v545_v8 = vcombine.low %v537_v6, %v544_v7 }
 0x241   :  { %547 = vst [vmem:[%s1009_s7] sm:$0xff] %v545_v8 }
 0x242   :  { %552 = vsyncpa [#allocation3], 1 }
 0x243   :  { %553 = vsyncpa [#allocation5], 1 }
 0x244   :  { %554 = vsyncpa [#allocation8], 1 }
 0x245   :  { %555 = vsyncpa [#allocation11], 1 }

// kernel: forward.6
= control target key start
LH: loop header
LB: loop body
LE: loop exit
PB: predicated region body
PF: predicated region fallthrough
CT: control target
= control target key end

     0   :  { %12 = vsyncpa [#allocation3], 0  ;;  %s1478_s0 = inlined_call_operand.vmem [shape: f32[32,32], index: 0, kind: input, shape index: {}]   ;;  %s1479_s1 = inlined_call_operand.hbm [shape: f32[1,32], index: 1, kind: input, shape index: {}]   ;;  %s1480_s2 = inlined_call_operand.hbm [shape: f32[1,32], index: 2, kind: input, shape index: {}]   ;;  %s1481_s3 = inlined_call_operand.hbm [shape: bf16[32,32], index: 3, kind: input, shape index: {}]   ;;  %s1482_s4 = inlined_call_operand.hbm [shape: f32[1,32], index: 4, kind: input, shape index: {}]   ;;  %s1483_s5 = inlined_call_operand.hbm [shape: bf16[32,384], index: 5, kind: input, shape index: {}]   ;;  %s1484_s6 = inlined_call_operand.hbm [shape: bf16[32,384], index: 6, kind: input, shape index: {}]   ;;  %s1485_s7 = inlined_call_operand.vmem [shape: f32[32,384], index: 7, kind: output, shape index: {}]  }
   0x1   :  { %13 = vsyncpa [#allocation5], 0 }
   0x2   :  { %14 = vsyncpa [#allocation8], 0 }
   0x3   :  { %15 = vsyncpa [#allocation11], 0  ;;  %s1266_s24 = smov 0  }
   0x4 LB: > { %s1213_s25 = smov [#allocation4]   ;;  %s840_s27 = sadd.s32 4294967295, %s1211_s24   ;;  %s1211_s24 = sphi %s1266_s24, %s21_s24  }
   0x5   : > { %s228_s26 = sshll.u32 %s1213_s25, 4  ;;  %p842_p0 = scmp.ge.s32.totalorder %s1211_s24, 1  ;;  %s1280_s26 = int_to_ptr.vmem [resolvable:$true] %s228_s26 }
   0x6   : > { %p204_p1 = scmp.lt.s32.totalorder %s1211_s24, 3  ;;  %p1276_p2 = scmp.eq.s32.totalorder %s840_s27, 0 }
   0x7   : > { %s1214_s30 = smov [#allocation7]   ;;  %s1215_s9 = smov [#allocation2]  }
   0x8   : > { %s1489_s28 = scalar_select %p1276_p2, 1, 0 }
   0x9   : > { %p1282_p3 = pnand %p842_p0, %p204_p1  ;;  %s252_s8 = sshll.u32 %s1214_s30, 4  ;;  %s1288_s8 = int_to_ptr.vmem [resolvable:$true] %s252_s8 }
   0xa   : > { %s217_s10 = sshll.u32 %s1215_s9, 4  ;;  %s1216_s12 = smov [#allocation6]   ;;  %s1296_s10 = int_to_ptr.vmem [resolvable:$true] %s217_s10 }
   0xb   : > { %s1490_s29 = scalar_select %p1282_p3, 1, 0 }
   0xc   : > { %p951_p4 = pneg %p1282_p3  ;;  %s238_s13 = sshll.u32 %s1216_s12, 4  ;;  %s1298_s13 = int_to_ptr.vmem [resolvable:$true] %s238_s13 }
   0xd   : > { %s1021_s16 = scalar_lea.hbm %s1480_s2, 16 }
   0xe   : > { %p1292_p5 = pnand %p1276_p2, %p951_p4  ;;  %p1022_p6 = scmp.ne.s32.totalorder %s1480_s2, %s1021_s16 }
   0xf   : > { %p1028_p10 = scmp.lt.u32.totalorder %s1021_s16, %s1480_s2 }
  0x10   : > { %p1308_p7 = pneg %p1292_p5 }
  0x12   : > { %p1024_p8 = pnand %p1308_p7, %p1022_p6 }
  0x14   : > { %p1025_p9 = pneg %p1024_p8 }
  0x16   : > { %p1030_p11 = pnand %p1028_p10, %p1025_p9 }
  0x18   : > { %1033 = shalt.err (!%p1030_p11)
}
  0x19   : > { %s1034_s22 = scalar_lea.vmem %s1280_s26, 16  ;;  %s1041_s23 = scalar_lea.vmem %s1280_s26, 32 }
  0x1a   : > { %p1035_p12 = scmp.ne.s32.totalorder %s1280_s26, %s1034_s22  ;;  %p1042_p1 = scmp.lt.s32.totalorder %s1280_s26, %s1280_s26 }
  0x1b   : > { %p1043_p4 = scmp.lt.s32.totalorder %s1041_s23, %s1034_s22 }
  0x1c   : > { %p1037_p13 = pnand %p1035_p12, %p1308_p7 }
  0x1d   : > { %p1044_p6 = por %p1043_p4, %p1042_p1 }
  0x1e   : > { %p1038_p0 = pneg %p1037_p13 }
  0x20   : > { %p1045_p8 = pnand %p1044_p6, %p1038_p0 }
  0x22   : > { %1048 = shalt.err (!%p1045_p8)
}
  0x23   : > { %957 = dma.hbm_to_vmem [thread:$0]  (!%p1292_p5), %s1480_s2, 16, %s1280_s26, [#allocation5]  }
  0x24   : > { %s1049_s14 = scalar_lea.hbm %s1482_s4, 16 }
  0x25   : > { %p1050_p9 = scmp.ne.s32.totalorder %s1482_s4, %s1049_s14  ;;  %p1056_p12 = scmp.lt.u32.totalorder %s1049_s14, %s1482_s4 }
  0x27   : > { %p1052_p10 = pnand %p1050_p9, %p1308_p7 }
  0x29   : > { %p1053_p11 = pneg %p1052_p10 }
  0x2b   : > { %p1058_p13 = pnand %p1056_p12, %p1053_p11 }
  0x2d   : > { %1061 = shalt.err (!%p1058_p13)
}
  0x2e   : > { %s1062_s26 = scalar_lea.vmem %s1288_s8, 16  ;;  %s1069_s20 = scalar_lea.vmem %s1288_s8, 32 }
  0x2f   : > { %p1063_p0 = scmp.ne.s32.totalorder %s1288_s8, %s1062_s26  ;;  %p1070_p6 = scmp.lt.s32.totalorder %s1288_s8, %s1288_s8 }
  0x30   : > { %p1071_p8 = scmp.lt.s32.totalorder %s1069_s20, %s1062_s26 }
  0x31   : > { %p1065_p1 = pnand %p1063_p0, %p1308_p7 }
  0x32   : > { %p1072_p9 = por %p1071_p8, %p1070_p6 }
  0x33   : > { %p1066_p4 = pneg %p1065_p1 }
  0x35   : > { %p1073_p10 = pnand %p1072_p9, %p1066_p4 }
  0x37   : > { %1076 = shalt.err (!%p1073_p10)
}
  0x38   : > { %963 = dma.hbm_to_vmem [thread:$0]  (!%p1292_p5), %s1482_s4, 16, %s1288_s8, [#allocation8]  }
  0x39   : > { %s1077_s30 = scalar_lea.hbm %s1479_s1, 16 }
  0x3a   : > { %p1078_p11 = scmp.ne.s32.totalorder %s1479_s1, %s1077_s30  ;;  %p1084_p0 = scmp.lt.u32.totalorder %s1077_s30, %s1479_s1 }
  0x3c   : > { %p1080_p12 = pnand %p1078_p11, %p1308_p7 }
  0x3e   : > { %p1081_p13 = pneg %p1080_p12 }
  0x40   : > { %p1086_p1 = pnand %p1084_p0, %p1081_p13 }
  0x42   : > { %1089 = shalt.err (!%p1086_p1)
}
  0x43   : > { %s1090_s8 = scalar_lea.vmem %s1296_s10, 16  ;;  %s1097_s16 = scalar_lea.vmem %s1296_s10, 32 }
  0x44   : > { %p1091_p4 = scmp.ne.s32.totalorder %s1296_s10, %s1090_s8  ;;  %p1098_p9 = scmp.lt.s32.totalorder %s1296_s10, %s1296_s10 }
  0x45   : > { %p1099_p10 = scmp.lt.s32.totalorder %s1097_s16, %s1090_s8 }
  0x46   : > { %p1093_p6 = pnand %p1091_p4, %p1308_p7 }
  0x47   : > { %p1100_p11 = por %p1099_p10, %p1098_p9 }
  0x48   : > { %p1094_p8 = pneg %p1093_p6 }
  0x4a   : > { %p1101_p12 = pnand %p1100_p11, %p1094_p8 }
  0x4c   : > { %1104 = shalt.err (!%p1101_p12)
}
  0x4d   : > { %954 = dma.hbm_to_vmem [thread:$0]  (!%p1292_p5), %s1479_s1, 16, %s1296_s10, [#allocation3]  }
  0x4e   : > { %s1105_s21 = scalar_lea.hbm %s1481_s3, 256 }
  0x4f   : > { %p1106_p13 = scmp.ne.s32.totalorder %s1481_s3, %s1105_s21  ;;  %p1112_p4 = scmp.lt.u32.totalorder %s1105_s21, %s1481_s3 }
  0x51   : > { %p1108_p0 = pnand %p1106_p13, %p1308_p7 }
  0x53   : > { %p1109_p1 = pneg %p1108_p0 }
  0x55   : > { %p1114_p6 = pnand %p1112_p4, %p1109_p1 }
  0x57   : > { %1117 = shalt.err (!%p1114_p6)
}
  0x58   : > { %s1118_s10 = scalar_lea.vmem %s1298_s13, 256  ;;  %p1126_p11 = scmp.lt.s32.totalorder %s1298_s13, %s1298_s13 }
  0x59   : > { %p1119_p8 = scmp.ne.s32.totalorder %s1298_s13, %s1118_s10  ;;  %p1127_p12 = scmp.lt.s32.totalorder %s1118_s10, %s1118_s10 }
  0x5b   : > { %p1121_p9 = pnand %p1119_p8, %p1308_p7  ;;  %p1128_p13 = por %p1127_p12, %p1126_p11 }
  0x5d   : > { %p1122_p10 = pneg %p1121_p9 }
  0x5f   : > { %p1129_p0 = pnand %p1128_p13, %p1122_p10 }
  0x61   : > { %1132 = shalt.err (!%p1129_p0)
}
  0x62   : > { %s1217_s9 = smov 64   ;;  %s1218_s12 = smov 4  }
  0x63   : > { %960 = dma.hbm_to_vmem [thread:$0]  (!%p1292_p5), %s1481_s3, 256, %s1298_s13, [#allocation5], %s1217_s9, %s1217_s9, %s1218_s12  }
  0x64   : > { %s1219_s8 = smov [#allocation9]   ;;  %s1133_s26 = scalar_lea.hbm %s1483_s5, 768 }
  0x65   : > { %s262_s16 = sshll.u32 %s1219_s8, 4  ;;  %p1134_p1 = scmp.ne.s32.totalorder %s1483_s5, %s1133_s26  ;;  %s263_s16 = int_to_ptr.vmem [resolvable:$true] %s262_s16 }
  0x66   : > { %p1140_p8 = scmp.lt.u32.totalorder %s1133_s26, %s1483_s5 }
  0x67   : > { %p1136_p4 = pnand %p1134_p1, %p1308_p7 }
  0x69   : > { %p1137_p6 = pneg %p1136_p4 }
  0x6b   : > { %p1142_p9 = pnand %p1140_p8, %p1137_p6 }
  0x6d   : > { %1145 = shalt.err (!%p1142_p9)
}
  0x6e   : > { %s1146_s13 = scalar_lea.vmem %s263_s16, 768  ;;  %p1154_p13 = scmp.lt.s32.totalorder %s263_s16, %s263_s16 }
  0x6f   : > { %p1147_p10 = scmp.ne.s32.totalorder %s263_s16, %s1146_s13  ;;  %p1155_p0 = scmp.lt.s32.totalorder %s1146_s13, %s1146_s13 }
  0x71   : > { %p1149_p11 = pnand %p1147_p10, %p1308_p7  ;;  %p1156_p2 = por %p1155_p0, %p1154_p13 }
  0x73   : > { %p1150_p12 = pneg %p1149_p11 }
  0x75   : > { %p1157_p3 = pnand %p1156_p2, %p1150_p12 }
  0x77   : > { %1160 = shalt.err (!%p1157_p3)
}
  0x78   : > { %s1220_s25 = smov 192   ;;  %s1221_s30 = smov 12  }
  0x79   : > { %966 = dma.hbm_to_vmem [thread:$0]  (!%p1292_p5), %s1483_s5, 768, %s263_s16, [#allocation8], %s1220_s25, %s1220_s25, %s1221_s30  }
  0x7a   : > { %s1222_s12 = smov [#allocation10]   ;;  %s1161_s17 = scalar_lea.hbm %s1484_s6, 768 }
  0x7b   : > { %s275_s14 = sshll.u32 %s1222_s12, 4  ;;  %p1162_p2 = scmp.ne.s32.totalorder %s1484_s6, %s1161_s17  ;;  %s276_s14 = int_to_ptr.vmem [resolvable:$true] %s275_s14 }
  0x7c   : > { %p1168_p4 = scmp.lt.u32.totalorder %s1161_s17, %s1484_s6 }
  0x7d   : > { %p1164_p3 = pnand %p1162_p2, %p1308_p7 }
  0x7f   : > { %p1165_p1 = pneg %p1164_p3 }
  0x81   : > { %p1170_p6 = pnand %p1168_p4, %p1165_p1 }
  0x83   : > { %1173 = shalt.err (!%p1170_p6)
}
  0x84   : > { %s1174_s16 = scalar_lea.vmem %s276_s14, 768  ;;  %p1182_p11 = scmp.lt.s32.totalorder %s276_s14, %s276_s14 }
  0x85   : > { %p1175_p8 = scmp.ne.s32.totalorder %s276_s14, %s1174_s16  ;;  %p1183_p12 = scmp.lt.s32.totalorder %s1174_s16, %s1174_s16 }
  0x87   : > { %p1177_p9 = pnand %p1175_p8, %p1308_p7  ;;  %p1184_p13 = por %p1183_p12, %p1182_p11 }
  0x89   : > { %p1178_p10 = pneg %p1177_p9 }
  0x8b   : > { %p1185_p0 = pnand %p1184_p13, %p1178_p10 }
  0x8d   : > { %1188 = shalt.err (!%p1185_p0)
}
  0x8e   : > { %969 = dma.hbm_to_vmem [thread:$0]  (!%p1292_p5), %s1484_s6, 768, %s276_s14, [#allocation11], %s1220_s25, %s1220_s25, %s1221_s30  }
  0x8f   : > { %p1493_p2 = scmp.ne.s32.totalorder %s1490_s29, 0 }
  0x90   : > { %p1494_p3 = scmp.ne.s32.totalorder (!%p1493_p2), %s1489_s28, 0 }
  0x91   : > { %300 = sbr.rel (%p1493_p2) target bundleno = 610 (0x262), region = 48 }
  0x98   : > { %1194 = dma.done.wait (%p1494_p3), [#allocation3], 16  }
  0x99   : > { %1196 = vsyncadd (%p1494_p3), [#allocation3], 4294967280 }
  0x9a   : > { %1198 = dma.done.wait (%p1494_p3), [#allocation5], 272  }
  0x9b   : > { %1200 = vsyncadd (%p1494_p3), [#allocation5], 4294967024 }
  0x9c   : > { %1202 = dma.done.wait (%p1494_p3), [#allocation8], 784  }
  0x9d   : > { %1204 = vsyncadd (%p1494_p3), [#allocation8], 4294966512 }
  0x9e   : > { %1206 = dma.done.wait (%p1494_p3), [#allocation11], 768  }
  0x9f   : > { %1208 = vsyncadd (%p1494_p3), [#allocation11], 4294966528  ;;  %s857_s29 = sshll.u32 %s840_s27, 1  ;;  %v1223_v0 = vmov 0.0   ;;  %vm1224_vm0 = vmmov 0   ;;  %v1225_v1 = vmov 0  }
  0xa0   : > { %894 = vmatprep.subr.bf16.mxu0 %v1223_v0  ;;  %898 = vmatprep.mubr.msk.bf16.mxu0 %vm1224_vm0, %v1223_v0  ;;  %p354_p5 = scmp.lt.s32.totalorder %s857_s29, 3  ;;  %v1003_v2 = vld [vmem:[#allocation6] sm:$0xff]   ;;  %v1004_v3 = vld [vmem:[#allocation6 + $0x8] sm:$0xff]   ;;  %v861_v6 = vld [vmem:[#allocation2] ss:$0 sm:$0xff]  ;;  %vm413_vm1 = vcmask 261120  }
  0xa1   : > { %545 = vmatprep.mubr.bf16.mxu1 %v1225_v1  ;;  %895 = vmatpush3.bf16.msra.mxu0 %v1003_v2  ;;  %v862_v9 = vld [vmem:[#allocation4] ss:$0 sm:$0xff]  ;;  %v1005_v10 = vld [vmem:[#allocation10 + $0x4] ss:$12 sps:$4 sm:$0xff]   ;;  %v1007_v11 = vld [vmem:[#allocation10] ss:$12 sps:$4 sm:$0xff]  }
  0xa2   : > { %s1496_s29 = smov (!%p354_p5, %s857_s29), 3  ;;  %896 = vmatprep.subr.bf16.mxu0 %v1223_v0  ;;  %513 = vmatprep.subr.bf16.mxu1 %v1005_v10  ;;  %v1009_v14 = vld [vmem:[#allocation10 + $0x1c] ss:$12 sps:$4 sm:$0xff]   ;;  %v1011_v15 = vld [vmem:[#allocation10 + $0x18] ss:$12 sps:$4 sm:$0xff]  }
  0xa3   : > { %s858_s11 = sshll.u32 %s1496_s29, 3  ;;  %514 = vmatpush1.bf16.msra.mxu1 %v1007_v11  ;;  %v1008_v18 = vld [vmem:[#allocation10 + $0x8] ss:$12 sps:$4 sm:$0xff]   ;;  %v1013_v21 = vld [vmem:[#allocation9] ss:$12 sps:$4 sm:$0xff]   ;;  %s926_s27 = smul.u32 24, %s1496_s29 }
  0xa4   : > { %s357_s28 = scalar_lea.vmem %s1478_s0, %s858_s11  ;;  %515 = vmatprep.subr.bf16.mxu1 %v1009_v14  ;;  %v1015_v20 = vld [vmem:[#allocation9 + $0x4] ss:$12 sps:$4 sm:$0xff]   ;;  %v1016_v24 = vld [vmem:[#allocation9 + $0x8] ss:$12 sps:$4 sm:$0xff]   ;;  %v1020_v27 = vld [vmem:[#allocation9 + $0x20] ss:$12 sps:$4 sm:$0xff]  }
  0xa5   : > { %v367_v4 = vld [vmem:[%s357_s28] sm:$0xff]  ;;  %v368_v5 = vld [vmem:[%s357_s28 + $0x8] sm:$0xff]  ;;  %897 = vmatpush3.bf16.msra.mxu0 %v1004_v3  ;;  %v863_v28 = vld [vmem:[#allocation7] ss:$0 sm:$0xff]  ;;  %s364_s10 = scalar_lea.vmem %s1485_s7, %s926_s27 }
  0xa6   : > { %v376_v7 = vmul.f32 %v861_v6, %v367_v4  ;;  %v377_v8 = vmul.f32 %v861_v6, %v368_v5  ;;  %902 = vmatprep.subr.bf16.mxu0 %v1223_v0  ;;  %v469_v22 = vpack.c.bf16 %v368_v5, %v367_v4  ;;  %v1012_v23 = vld [vmem:[#allocation10 + $0x20] ss:$12 sps:$4 sm:$0xff]   ;;  %v1017_v26 = vld [vmem:[#allocation9 + $0x18] ss:$12 sps:$4 sm:$0xff]  }
  0xa7   : > { %516 = vmatpush1.bf16.msra.mxu1 %v1011_v15  ;;  %v1019_v25 = vld [vmem:[#allocation9 + $0x1c] ss:$12 sps:$4 sm:$0xff]  }
  0xa8   : > { %v385_v12 = vadd.f32 %v862_v9, %v376_v7  ;;  %v386_v13 = vadd.f32 %v862_v9, %v377_v8  ;;  %632 = vmatprep.subr.bf16.mxu1 %v1015_v20 }
  0xaa   : > { %v387_v16 = vmax.f32 %v385_v12, 0.0  ;;  %v388_v17 = vmax.f32 %v386_v13, 0.0  ;;  %873 = vmatmul.mubr.msk.bf16.vlgmr.msra.gmra.mrb[0].mxu1 %vm413_vm1, %v469_v22 }
  0xab   : > { %633 = vmatpush1.bf16.msra.mxu1 %v1013_v21  ;;  %664 = vmatprep.mubr.bf16.mxu1 %v1225_v1 }
  0xac   : > { %v389_v19 = vpack.c.bf16 %v388_v17, %v387_v16  ;;  %634 = vmatprep.subr.bf16.mxu1 %v1019_v25 }
  0xae   : > { %899 = vmatmul.mubr.msk.bf16.vlgmr.msra.gmra.mrb[0].mxu0 %vm413_vm1, %v389_v19 }
  0xaf   : > { %903 = vmatpush3.bf16.msra.mxu0 %v1008_v18  ;;  %906 = vmatprep.mubr.msk.bf16.mxu0 %vm1224_vm0, %v1223_v0 }
  0xb0   : > { %904 = vmatprep.subr.bf16.mxu0 %v1223_v0  ;;  %635 = vmatpush1.bf16.msra.mxu1 %v1017_v26 }
  0xb3   : > { %905 = vmatpush3.bf16.msra.mxu0 %v1012_v23 }
  0xb4   : > { %910 = vmatprep.subr.bf16.mxu0 %v1223_v0 }
  0xb6   : > { %907 = vmatmul.mubr.msk.bf16.vlgmr.msra.gmra.mrb[4].mxu0 %vm413_vm1, %v469_v22 }
  0xb7   : > { %911 = vmatpush3.bf16.msra.mxu0 %v1016_v24  ;;  %914 = vmatprep.mubr.msk.bf16.mxu0 %vm1224_vm0, %v1223_v0 }
  0xb8   : > { %912 = vmatprep.subr.bf16.mxu0 %v1223_v0 }
  0xbb   : > { %913 = vmatpush3.bf16.msra.mxu0 %v1020_v27 }
 0x181   : > { %v451_v29 = vpop.f32.mrb[0].mxu0 }
 0x182   : > { %v452_v30 = vadd.f32 %v863_v28, %v451_v29  ;;  %v900_v31 = vpop.f32.mrb[1].mxu0 }
 0x183   : > { %v454_v32 = vpop.f32.mrb[2].mxu0 }
 0x184   : > { %v455_v33 = vadd.f32 %v863_v28, %v454_v32  ;;  %v901_v34 = vpop.f32.mrb[3].mxu0  ;;  %v458_v35 = vmax.f32 %v452_v30, 0.0 }
 0x186   : > { %v459_v36 = vmax.f32 %v455_v33, 0.0 }
 0x188   : > { %v460_v37 = vpack.c.bf16 %v459_v36, %v458_v35 }
 0x18a   : > { %881 = vmatmul.mubr.msk.bf16.vlgmr.msra.gmra.mrb[0].mxu1 %vm413_vm1, %v460_v37  ;;  %915 = vmatmul.mubr.msk.bf16.vlgmr.msra.gmra.mrb[4].mxu0 %vm413_vm1, %v460_v37 }
 0x25d   : > { %v666_v38 = vpop.f32.mrb[0].mxu1  ;;  %v709_v39 = vpop.f32.mrb[4].mxu0 }
 0x25e   : > { %716 = vst [vmem:[%s364_s10] sm:$0xff] %v666_v38  ;;  %718 = vst [vmem:[%s364_s10 + $0x10] sm:$0xff] %v709_v39  ;;  %v668_v40 = vpop.f32.mrb[1].mxu1  ;;  %v916_v41 = vpop.f32.mrb[5].mxu0 }
 0x25f   : > { %717 = vst [vmem:[%s364_s10 + $0x8] sm:$0xff] %v668_v40  ;;  %v670_v42 = vpop.f32.mrb[2].mxu1  ;;  %v712_v43 = vpop.f32.mrb[6].mxu0 }
 0x260   : > { %719 = vst [vmem:[%s364_s10 + $0x18] sm:$0xff] %v670_v42  ;;  %721 = vst [vmem:[%s364_s10 + $0x28] sm:$0xff] %v712_v43  ;;  %v672_v44 = vpop.f32.mrb[3].mxu1  ;;  %v917_v45 = vpop.f32.mrb[7].mxu0 }
 0x261   : > { %720 = vst [vmem:[%s364_s10 + $0x20] sm:$0xff] %v672_v44 }
 0x262 PF: > { %s21_s24 = sadd.s32 1, %s1211_s24  }
 0x263   : > { %p18_p7 = scmp.ge.s32.totalorder %s21_s24, 4  }
 0x265   :  { %20 = sbr.rel (!%p18_p7) target bundleno = 4 (0x4), region = 103 }
 0x26c   :  { %746 = vsyncpa [#allocation3], 1 }
 0x26d   :  { %748 = vsyncpa [#allocation3 + $0x1], 1 }
 0x26e   :  { %749 = vsyncpa [#allocation5], 1 }
 0x26f   :  { %750 = vsyncpa [#allocation8], 1 }
 0x270   :  { %751 = vsyncpa [#allocation11], 1 }

// kernel: forward.7
= control target key start
LH: loop header
LB: loop body
LE: loop exit
PB: predicated region body
PF: predicated region fallthrough
CT: control target
= control target key end

     0   :  { %s893_s24 = smov 0   ;;  %s988_s0 = inlined_call_operand.vmem [shape: f32[128,24], index: 0, kind: input, shape index: {}]   ;;  %s989_s1 = inlined_call_operand.vmem [shape: f32[1,24], index: 1, kind: input, shape index: {}]   ;;  %s990_s2 = inlined_call_operand.vmem [shape: f32[1,24], index: 2, kind: input, shape index: {}]   ;;  %s991_s3 = inlined_call_operand.vmem [shape: bf16[24,24], index: 3, kind: input, shape index: {}]   ;;  %s992_s4 = inlined_call_operand.vmem [shape: f32[1,24], index: 4, kind: input, shape index: {}]   ;;  %s993_s5 = inlined_call_operand.vmem [shape: bf16[24,256], index: 5, kind: input, shape index: {}]   ;;  %s994_s6 = inlined_call_operand.vmem [shape: bf16[24,256], index: 6, kind: input, shape index: {}]   ;;  %s995_s7 = inlined_call_operand.vmem [shape: f32[128,256], index: 7, kind: output, shape index: {}]  }
   0x1 LB: > { %s744_s25 = sadd.s32 4294967295, %s850_s24   ;;  %p748_p0 = scmp.ge.s32.totalorder %s850_s24, 1  ;;  %s850_s24 = sphi %s893_s24, %s17_s24  }
   0x2   : > { %p238_p1 = scmp.lt.s32.totalorder %s850_s24, 3 }
   0x4   : > { %p239_p2 = pnand %p748_p0, %p238_p1 }
   0x5   : > { %v832_v0 = vld [vmem:[%s991_s3] sm:$0xff] (!%p239_p2)   ;;  %v833_v1 = vld [vmem:[%s991_s3 + $0x8] ss:$0 sps:$4 sm:$0xff] (!%p239_p2)   ;;  %vm367_vm0 = vcmask (!%p239_p2), 1043456   ;;  %s749_s30 = sshll.u32 (!%p239_p2), %s744_s25, 3  ;;  %v457_v5 = vld [vmem:[%s994_s6 + $0x10] sm:$0xff] (!%p239_p2) }
   0x6   : > { %242 = sbr.rel (%p239_p2) target bundleno = 487 (0x1e7), region = 48  ;;  %790 = vmatprep.subr.bf16.mxu0 (!%p239_p2), %v832_v0  ;;  %p272_p3 = scmp.lt.s32.totalorder (!%p239_p2), %s749_s30, 15  ;;  %v834_v2 = vld [vmem:[%s994_s6 + $0x4] ss:$8 sps:$4 sm:$0xff] (!%p239_p2)   ;;  %v836_v3 = vld [vmem:[%s994_s6] ss:$8 sps:$4 sm:$0xff] (!%p239_p2)   ;;  %v766_v6 = vcombine.high (!%p239_p2), %v457_v5, %v457_v5  ;;  %v765_v7 = vcombine.low (!%p239_p2), %v457_v5, %v457_v5 }
   0x7   : > { %791 = vmatpush3.bf16.msra.mxu0 (!%p239_p2), %v832_v0  ;;  %v369_v4 = vsel (!%p239_p2), %vm367_vm0, %v833_v1, 0  ;;  %802 = vmatprep.subr.bf16.mxu1 (!%p239_p2), %v834_v2  ;;  %v754_v8 = vld [vmem:[%s989_s1] ss:$0 sm:$0xff] (!%p239_p2)  ;;  %vm354_vm1 = vcmask (!%p239_p2), 195584   ;;  %v841_v48 = vld [vmem:[%s993_s5 + $0x4] ss:$8 sps:$4 sm:$0xff] (!%p239_p2)  }
   0x8   : > { %822 = vmatprep.subr.msk.bf16.mxu0 (!%p239_p2), %vm367_vm0, %v833_v1  ;;  %804 = vmatpush1.bf16.msra.mxu1 (!%p239_p2), %v836_v3  ;;  %v755_v9 = vld [vmem:[%s990_s2] ss:$0 sm:$0xff] (!%p239_p2)  ;;  %v486_v10 = vsel (!%p239_p2), %vm367_vm0, %v765_v7, 0  ;;  %v852_v50 = vmov (!%p239_p2), 0   ;;  %v450_v52 = vld [vmem:[%s993_s5 + $0x10] sm:$0xff] (!%p239_p2) }
   0x9   : > { %803 = vmatprep.subr.msk.bf16.mxu1 (!%p239_p2), %vm367_vm0, %v766_v6  ;;  %553 = vmatprep.mubr.bf16.mxu1 (!%p239_p2), %v852_v50  ;;  %v839_v51 = vld [vmem:[%s993_s5] ss:$8 sps:$4 sm:$0xff] (!%p239_p2)   ;;  %v775_v53 = vcombine.high (!%p239_p2), %v450_v52, %v450_v52  ;;  %v774_v54 = vcombine.low (!%p239_p2), %v450_v52, %v450_v52 }
   0xa   : > { %v756_v58 = vld [vmem:[%s992_s4] ss:$0 sm:$0xff] (!%p239_p2) }
   0xb   : > { %793 = vmatpush3.bf16.msra.mxu0 (!%p239_p2), %v369_v4  ;;  %v592_v55 = vsel (!%p239_p2), %vm367_vm0, %v774_v54, 0 }
   0xc   : > { %491 = vmatprep.subr.bf16.mxu0 (!%p239_p2), %v834_v2  ;;  %805 = vmatpush1.bf16.msra.mxu1 (!%p239_p2), %v486_v10 }
   0xd   : > { %s997_s30 = smov (!%p272_p3, %s749_s30), 15  ;;  %597 = vmatprep.subr.bf16.mxu1 %v841_v48 }
   0xe   : > { %s750_s14 = sshll.u32 %s997_s30, 3  ;;  %s783_s9 = sshll.u32 %s997_s30, 4 }
   0xf   : > { %s275_s19 = scalar_lea.vmem %s988_s0, %s750_s14  ;;  %s967_s12 = scalar_lea.vmem %s995_s7, %s783_s9 }
  0x10   : > { %v285_v11 = vld [vmem:[%s275_s19] sm:$0xff]  ;;  %v286_v12 = vld [vmem:[%s275_s19 + $0x8] sm:$0xff]  ;;  %v932_v13 = vld [vmem:[%s275_s19 + $0x10] sm:$0xff] }
  0x11   : > { %v300_v14 = vmul.f32 %v754_v8, %v285_v11  ;;  %v301_v15 = vmul.f32 %v754_v8, %v286_v12  ;;  %v451_v16 = vpack.c.bf16 %v286_v12, %v285_v11  ;;  %v288_v17 = vld [vmem:[%s275_s19 + $0x18] sm:$0xff]  ;;  %v302_v18 = vmul.f32 %v754_v8, %v932_v13  ;;  %v289_v19 = vld [vmem:[%s275_s19 + $0x20] sm:$0xff]  ;;  %v290_v20 = vld [vmem:[%s275_s19 + $0x28] sm:$0xff] }
  0x12   : > { %v303_v21 = vmul.f32 %v754_v8, %v288_v17  ;;  %v304_v22 = vmul.f32 %v754_v8, %v289_v19  ;;  %v305_v23 = vmul.f32 %v754_v8, %v290_v20  ;;  %v291_v24 = vld [vmem:[%s275_s19 + $0x30] sm:$0xff]  ;;  %v292_v25 = vld [vmem:[%s275_s19 + $0x38] sm:$0xff]  ;;  %v452_v56 = vpack.c.bf16 %v288_v17, %v932_v13 }
  0x13   : > { %v315_v26 = vadd.f32 %v755_v9, %v300_v14  ;;  %v316_v27 = vadd.f32 %v755_v9, %v301_v15  ;;  %v317_v28 = vadd.f32 %v755_v9, %v302_v18  ;;  %v306_v29 = vmul.f32 %v754_v8, %v291_v24 }
  0x14   : > { %v318_v30 = vadd.f32 %v755_v9, %v303_v21  ;;  %v319_v31 = vadd.f32 %v755_v9, %v304_v22  ;;  %v320_v32 = vadd.f32 %v755_v9, %v305_v23  ;;  %v307_v33 = vmul.f32 %v754_v8, %v292_v25 }
  0x15   : > { %v323_v34 = vmax.f32 %v315_v26, 0.0  ;;  %v324_v35 = vmax.f32 %v316_v27, 0.0  ;;  %v325_v36 = vmax.f32 %v317_v28, 0.0  ;;  %v321_v37 = vadd.f32 %v755_v9, %v306_v29 }
  0x16   : > { %v326_v38 = vmax.f32 %v318_v30, 0.0  ;;  %v327_v39 = vmax.f32 %v319_v31, 0.0  ;;  %v328_v40 = vmax.f32 %v320_v32, 0.0  ;;  %v322_v41 = vadd.f32 %v755_v9, %v307_v33 }
  0x17   : > { %v331_v42 = vpack.c.bf16 %v324_v35, %v323_v34  ;;  %v329_v45 = vmax.f32 %v321_v37, 0.0  ;;  %v454_v49 = vpack.c.bf16 %v292_v25, %v291_v24  ;;  %v453_v57 = vpack.c.bf16 %v290_v20, %v289_v19 }
  0x18   : > { %v332_v43 = vpack.c.bf16 %v326_v38, %v325_v36  ;;  %v333_v44 = vpack.c.bf16 %v328_v40, %v327_v39  ;;  %v330_v46 = vmax.f32 %v322_v41, 0.0 }
  0x19   : > { %794 = vmatprep.mubr.msk.bf16.mxu0 %vm354_vm1, %v331_v42  ;;  %771 = vmatmul.mubr.msk.bf16.vlgmr.msra.gmra.mrb[0].mxu1 %vm354_vm1, %v454_v49 }
  0x1a   : > { %795 = vmatmul.mubr.msk.bf16.vlgmr.msra.gmra.mrb[0].mxu0 %vm354_vm1, %v332_v43  ;;  %v334_v47 = vpack.c.bf16 %v330_v46, %v329_v45  ;;  %598 = vmatpush1.bf16.msra.mxu1 %v839_v51 }
  0x1b   : > { %798 = vmatprep.mubr.msk.bf16.mxu0 %vm354_vm1, %v333_v44  ;;  %492 = vmatpush1.bf16.msra.mxu0 %v836_v3 }
  0x1c   : > { %767 = vmatprep.subr.msk.bf16.mxu0 %vm367_vm0, %v766_v6  ;;  %629 = vmatprep.mubr.bf16.mxu1 %v852_v50 }
  0x1d   : > { %776 = vmatprep.subr.msk.bf16.mxu1 %vm367_vm0, %v775_v53 }
  0x1e   : > { %600 = vmatpush1.bf16.msra.mxu1 %v592_v55 }
  0x1f   : > { %494 = vmatpush1.bf16.msra.mxu0 %v486_v10 }
  0x22   : > { %799 = vmatmul.mubr.msk.bf16.gmra.mrb[4].mxu0 %vm354_vm1, %v334_v47 }
  0x23   : > { %523 = vmatprep.mubr.bf16.mxu0 %v852_v50 }
  0x2a   : > { %768 = vmatmul.mubr.msk.bf16.vlgmr.msra.gmra.mrb[8].mxu0 %vm354_vm1, %v451_v16 }
  0x2b   : > { %533 = vmatprep.mubr.bf16.mxu0 %v852_v50 }
  0x32   : > { %769 = vmatmul.mubr.msk.bf16.gmra.mrb[12].mxu0 %vm354_vm1, %v452_v56 }
  0x33   : > { %543 = vmatprep.mubr.bf16.mxu0 %v852_v50 }
  0x3a   : > { %770 = vmatmul.mubr.msk.bf16.gmra.mrb[16].mxu0 %vm354_vm1, %v453_v57 }
  0xed   : > { %v796_v59 = vpop.f32.mrb[0].mxu0 }
  0xee   : > { %v414_v60 = vadd.f32 %v796_v59, %v756_v58  ;;  %v405_v61 = vpop.f32.mrb[1].mxu0 }
  0xef   : > { %v406_v62 = vadd.f32 %v756_v58, %v405_v61  ;;  %v797_v63 = vpop.f32.mrb[2].mxu0 }
  0xf0   : > { %v417_v0 = vadd.f32 %v797_v63, %v756_v58  ;;  %v408_v1 = vpop.f32.mrb[3].mxu0  ;;  %v438_v3 = vmax.f32 %v414_v60, 0.0 }
  0xf1   : > { %v409_v2 = vadd.f32 %v756_v58, %v408_v1  ;;  %v436_v5 = vmax.f32 %v406_v62, 0.0 }
  0xf2   : > { %v439_v4 = vmax.f32 %v417_v0, 0.0 }
  0xf3   : > { %v437_v6 = vmax.f32 %v409_v2, 0.0 }
  0xf4   : > { %v445_v7 = vpack.c.bf16 %v439_v4, %v438_v3 }
  0xf5   : > { %v444_v8 = vpack.c.bf16 %v437_v6, %v436_v5  ;;  %v800_v9 = vpop.f32.mrb[4].mxu0 }
  0xf6   : > { %v430_v10 = vadd.f32 %v800_v9, %v756_v58  ;;  %v421_v11 = vpop.f32.mrb[5].mxu0 }
  0xf7   : > { %777 = vmatmul.mubr.msk.bf16.vlgmr.msra.gmra.mrb[4].mxu1 %vm354_vm1, %v444_v8  ;;  %v422_v12 = vadd.f32 %v756_v58, %v421_v11  ;;  %v801_v13 = vpop.f32.mrb[6].mxu0 }
  0xf8   : > { %v442_v14 = vmax.f32 %v430_v10, 0.0  ;;  %v433_v15 = vadd.f32 %v801_v13, %v756_v58  ;;  %v424_v16 = vpop.f32.mrb[7].mxu0  ;;  %639 = vmatprep.mubr.bf16.mxu1 %v852_v50 }
  0xf9   : > { %v440_v17 = vmax.f32 %v422_v12, 0.0  ;;  %v425_v18 = vadd.f32 %v756_v58, %v424_v16 }
  0xfa   : > { %v443_v19 = vmax.f32 %v433_v15, 0.0 }
  0xfb   : > { %v441_v20 = vmax.f32 %v425_v18, 0.0 }
  0xfc   : > { %v447_v21 = vpack.c.bf16 %v443_v19, %v442_v14 }
  0xfd   : > { %v446_v22 = vpack.c.bf16 %v441_v20, %v440_v17  ;;  %v525_v23 = vpop.f32.mrb[8].mxu0 }
  0xfe   : > { %v527_v24 = vpop.f32.mrb[9].mxu0 }
  0xff   : > { %778 = vmatmul.mubr.msk.bf16.gmra.mrb[8].mxu1 %vm354_vm1, %v445_v7  ;;  %v529_v25 = vpop.f32.mrb[10].mxu0 }
 0x100   : > { %649 = vmatprep.mubr.bf16.mxu1 %v852_v50  ;;  %v531_v26 = vpop.f32.mrb[11].mxu0 }
 0x105   : > { %v535_v27 = vpop.f32.mrb[12].mxu0 }
 0x106   : > { %v537_v28 = vpop.f32.mrb[13].mxu0 }
 0x107   : > { %779 = vmatmul.mubr.msk.bf16.gmra.mrb[12].mxu1 %vm354_vm1, %v446_v22  ;;  %v539_v29 = vpop.f32.mrb[14].mxu0 }
 0x108   : > { %659 = vmatprep.mubr.bf16.mxu1 %v852_v50  ;;  %v541_v30 = vpop.f32.mrb[15].mxu0 }
 0x10d   : > { %v545_v31 = vpop.f32.mrb[16].mxu0 }
 0x10e   : > { %v547_v32 = vpop.f32.mrb[17].mxu0 }
 0x10f   : > { %780 = vmatmul.mubr.msk.bf16.gmra.mrb[0].mxu1 %vm354_vm1, %v447_v21  ;;  %v549_v33 = vpop.f32.mrb[18].mxu0 }
 0x110   : > { %v551_v34 = vpop.f32.mrb[19].mxu0 }
 0x1ca   : > { %v631_v35 = vpop.f32.mrb[4].mxu1 }
 0x1cb   : > { %v632_v36 = vadd.f32 %v631_v35, %v525_v23  ;;  %v633_v37 = vpop.f32.mrb[5].mxu1 }
 0x1cc   : > { %v634_v38 = vadd.f32 %v633_v37, %v527_v24  ;;  %v635_v39 = vpop.f32.mrb[6].mxu1 }
 0x1cd   : > { %670 = vst [vmem:[%s967_s12] sm:$0xff] %v632_v36  ;;  %v636_v40 = vadd.f32 %v635_v39, %v529_v25  ;;  %v637_v41 = vpop.f32.mrb[7].mxu1 }
 0x1ce   : > { %671 = vst [vmem:[%s967_s12 + $0x8] sm:$0xff] %v634_v38  ;;  %v638_v42 = vadd.f32 %v637_v41, %v531_v26 }
 0x1cf   : > { %672 = vst [vmem:[%s967_s12 + $0x10] sm:$0xff] %v636_v40 }
 0x1d0   : > { %673 = vst [vmem:[%s967_s12 + $0x18] sm:$0xff] %v638_v42 }
 0x1d2   : > { %v641_v43 = vpop.f32.mrb[8].mxu1 }
 0x1d3   : > { %v642_v44 = vadd.f32 %v641_v43, %v535_v27  ;;  %v643_v45 = vpop.f32.mrb[9].mxu1 }
 0x1d4   : > { %v644_v46 = vadd.f32 %v643_v45, %v537_v28  ;;  %v645_v47 = vpop.f32.mrb[10].mxu1 }
 0x1d5   : > { %674 = vst [vmem:[%s967_s12 + $0x20] sm:$0xff] %v642_v44  ;;  %v646_v48 = vadd.f32 %v645_v47, %v539_v29  ;;  %v647_v49 = vpop.f32.mrb[11].mxu1 }
 0x1d6   : > { %675 = vst [vmem:[%s967_s12 + $0x28] sm:$0xff] %v644_v46  ;;  %v648_v50 = vadd.f32 %v647_v49, %v541_v30 }
 0x1d7   : > { %676 = vst [vmem:[%s967_s12 + $0x30] sm:$0xff] %v646_v48 }
 0x1d8   : > { %677 = vst [vmem:[%s967_s12 + $0x38] sm:$0xff] %v648_v50 }
 0x1da   : > { %v651_v51 = vpop.f32.mrb[12].mxu1 }
 0x1db   : > { %v652_v52 = vadd.f32 %v651_v51, %v545_v31  ;;  %v653_v53 = vpop.f32.mrb[13].mxu1 }
 0x1dc   : > { %v654_v54 = vadd.f32 %v653_v53, %v547_v32  ;;  %v655_v55 = vpop.f32.mrb[14].mxu1 }
 0x1dd   : > { %678 = vst [vmem:[%s967_s12 + $0x40] sm:$0xff] %v652_v52  ;;  %v656_v56 = vadd.f32 %v655_v55, %v549_v33  ;;  %v657_v57 = vpop.f32.mrb[15].mxu1 }
 0x1de   : > { %679 = vst [vmem:[%s967_s12 + $0x48] sm:$0xff] %v654_v54  ;;  %v658_v58 = vadd.f32 %v657_v57, %v551_v34 }
 0x1df   : > { %680 = vst [vmem:[%s967_s12 + $0x50] sm:$0xff] %v656_v56 }
 0x1e0   : > { %681 = vst [vmem:[%s967_s12 + $0x58] sm:$0xff] %v658_v58 }
 0x1e2   : > { %v661_v59 = vpop.f32.mrb[0].mxu1 }
 0x1e3   : > { %682 = vst [vmem:[%s967_s12 + $0x60] sm:$0xff] %v661_v59  ;;  %v663_v60 = vpop.f32.mrb[1].mxu1 }
 0x1e4   : > { %683 = vst [vmem:[%s967_s12 + $0x68] sm:$0xff] %v663_v60  ;;  %v665_v61 = vpop.f32.mrb[2].mxu1 }
 0x1e5   : > { %684 = vst [vmem:[%s967_s12 + $0x70] sm:$0xff] %v665_v61  ;;  %v667_v62 = vpop.f32.mrb[3].mxu1 }
 0x1e6   : > { %685 = vst [vmem:[%s967_s12 + $0x78] sm:$0xff] %v667_v62 }
 0x1e7 PF: > { %s17_s24 = sadd.s32 1, %s850_s24  }
 0x1e8   : > { %p14_p4 = scmp.ge.s32.totalorder %s17_s24, 4  }
 0x1ea   :  { %16 = sbr.rel (!%p14_p4) target bundleno = 1 (0x1), region = 78 }

// kernel: forward.8
= control target key start
LH: loop header
LB: loop body
LE: loop exit
PB: predicated region body
PF: predicated region fallthrough
CT: control target
= control target key end

     0   :  { %s1563_s24 = smov 0   ;;  %s1900_s0 = inlined_call_operand.vmem [shape: f32[512,16], index: 0, kind: input, shape index: {}]   ;;  %s1901_s1 = inlined_call_operand.vmem [shape: f32[1,16], index: 1, kind: input, shape index: {}]   ;;  %s1902_s2 = inlined_call_operand.vmem [shape: f32[1,16], index: 2, kind: input, shape index: {}]   ;;  %s1903_s3 = inlined_call_operand.vmem [shape: bf16[16,16], index: 3, kind: input, shape index: {}]   ;;  %s1904_s4 = inlined_call_operand.vmem [shape: f32[1,16], index: 4, kind: input, shape index: {}]   ;;  %s1905_s5 = inlined_call_operand.vmem [shape: bf16[16,128], index: 5, kind: input, shape index: {}]   ;;  %s1906_s6 = inlined_call_operand.vmem [shape: bf16[16,128], index: 6, kind: input, shape index: {}]   ;;  %s1907_s7 = inlined_call_operand.vmem [shape: f32[512,128], index: 7, kind: output, shape index: {}]  }
   0x1 LB: > { %s1252_s25 = sadd.s32 4294967295, %s1521_s24   ;;  %p1256_p0 = scmp.ge.s32.totalorder %s1521_s24, 1  ;;  %s1521_s24 = sphi %s1563_s24, %s17_s24  }
   0x2   : > { %p238_p1 = scmp.lt.s32.totalorder %s1521_s24, 3 }
   0x4   : > { %p239_p2 = pnand %p1256_p0, %p238_p1 }
   0x5   : > { %v1512_v0 = vld [vmem:[%s1903_s3] sm:$0xff] (!%p239_p2)   ;;  %s1257_s28 = sshll.u32 (!%p239_p2), %s1252_s25, 5  ;;  %vm456_vm0 = vcmask (!%p239_p2), 130048  }
   0x6   : > { %242 = sbr.rel (%p239_p2) target bundleno = 520 (0x208), region = 48  ;;  %p271_p3 = scmp.lt.s32.totalorder (!%p239_p2), %s1257_s28, 63  ;;  %1368 = vmatprep.subr.bf16.mxu0 (!%p239_p2), %v1512_v0  ;;  %v1577_v1 = vld [vmem:[%s1906_s6] sm:$0xff] (!%p239_p2)  }
   0x7   : > { %1369 = vmatpush3.bf16.msra.mxu0 (!%p239_p2), %v1512_v0  ;;  %v1584_v2 = vld [vmem:[%s1905_s5] sm:$0xff] (!%p239_p2)   ;;  %1470 = vmatprep.subr.bf16.mxu1 (!%p239_p2), %v1577_v1 }
   0x8   : > { %1402 = vmatprep.subr.bf16.mxu0 (!%p239_p2), %v1577_v1  ;;  %v1592_v3 = vld [vmem:[%s1901_s1] ss:$0 sm:$0xff] (!%p239_p2)  ;;  %1471 = vmatpush3.bf16.msra.mxu1 (!%p239_p2), %v1577_v1 }
   0x9   : > { %v1605_v4 = vld [vmem:[%s1902_s2] ss:$0 sm:$0xff] (!%p239_p2)  ;;  %1436 = vmatprep.subr.bf16.mxu1 (!%p239_p2), %v1584_v2 }
   0xd   : > { %s1909_s28 = smov (!%p271_p3, %s1257_s28), 63 }
   0xe   : > { %s1258_s10 = sshll.u32 %s1909_s28, 3 }
   0xf   : > { %s1600_s15 = scalar_lea.vmem %s1900_s0, %s1258_s10  ;;  %s1863_s22 = scalar_lea.vmem %s1907_s7, %s1258_s10 }
  0x10   : > { %v1609_v5 = vld [vmem:[%s1600_s15] sm:$0xff]  ;;  %v1612_v6 = vld [vmem:[%s1600_s15 + $0x8] sm:$0xff]  ;;  %v1615_v7 = vld [vmem:[%s1600_s15 + $0x10] sm:$0xff] }
  0x11   : > { %v322_v8 = vmul.f32 %v1592_v3, %v1609_v5  ;;  %v323_v9 = vmul.f32 %v1592_v3, %v1612_v6  ;;  %v1622_v10 = vld [vmem:[%s1600_s15 + $0x18] sm:$0xff]  ;;  %v324_v11 = vmul.f32 %v1592_v3, %v1615_v7  ;;  %v1627_v12 = vld [vmem:[%s1600_s15 + $0x20] sm:$0xff]  ;;  %v1630_v13 = vld [vmem:[%s1600_s15 + $0x28] sm:$0xff] }
  0x12   : > { %v325_v14 = vmul.f32 %v1592_v3, %v1622_v10  ;;  %v717_v15 = vpack.c.bf16 %v1622_v10, %v1615_v7  ;;  %v326_v16 = vmul.f32 %v1592_v3, %v1627_v12  ;;  %v327_v17 = vmul.f32 %v1592_v3, %v1630_v13  ;;  %v1641_v18 = vld [vmem:[%s1600_s15 + $0x30] sm:$0xff]  ;;  %v1644_v19 = vld [vmem:[%s1600_s15 + $0x38] sm:$0xff]  ;;  %v1657_v28 = vld [vmem:[%s1600_s15 + $0x40] sm:$0xff] }
  0x13   : > { %v361_v20 = vadd.f32 %v1605_v4, %v322_v8  ;;  %v362_v21 = vadd.f32 %v1605_v4, %v323_v9  ;;  %v363_v22 = vadd.f32 %v1605_v4, %v324_v11  ;;  %v328_v23 = vmul.f32 %v1592_v3, %v1641_v18  ;;  %v1660_v29 = vld [vmem:[%s1600_s15 + $0x48] sm:$0xff]  ;;  %v1669_v41 = vld [vmem:[%s1600_s15 + $0x50] sm:$0xff]  ;;  %v1672_v42 = vld [vmem:[%s1600_s15 + $0x58] sm:$0xff] }
  0x14   : > { %v364_v24 = vadd.f32 %v1605_v4, %v325_v14  ;;  %v365_v25 = vadd.f32 %v1605_v4, %v326_v16  ;;  %v366_v26 = vadd.f32 %v1605_v4, %v327_v17  ;;  %v329_v27 = vmul.f32 %v1592_v3, %v1644_v19  ;;  %v1675_v45 = vld [vmem:[%s1600_s15 + $0x60] sm:$0xff]  ;;  %v1678_v46 = vld [vmem:[%s1600_s15 + $0x68] sm:$0xff]  ;;  %v1699_v63 = vld [vmem:[%s1600_s15 + $0x70] sm:$0xff] }
  0x15   : > { %v393_v30 = vmax.f32 %v361_v20, 0.0  ;;  %v394_v31 = vmax.f32 %v362_v21, 0.0  ;;  %v395_v32 = vmax.f32 %v363_v22, 0.0  ;;  %v367_v33 = vadd.f32 %v1605_v4, %v328_v23  ;;  %v1702_v0 = vld [vmem:[%s1600_s15 + $0x78] sm:$0xff]  ;;  %v299_v8 = vld [vmem:[%s1600_s15 + $0x80] sm:$0xff]  ;;  %v300_v9 = vld [vmem:[%s1600_s15 + $0x88] sm:$0xff] }
  0x16   : > { %v396_v34 = vmax.f32 %v364_v24, 0.0  ;;  %v397_v35 = vmax.f32 %v365_v25, 0.0  ;;  %v398_v36 = vmax.f32 %v366_v26, 0.0  ;;  %v368_v37 = vadd.f32 %v1605_v4, %v329_v27  ;;  %v301_v26 = vld [vmem:[%s1600_s15 + $0x90] sm:$0xff] }
  0x17   : > { %v425_v38 = vpack.c.bf16 %v394_v31, %v393_v30  ;;  %v330_v39 = vmul.f32 %v1592_v3, %v1657_v28  ;;  %v331_v40 = vmul.f32 %v1592_v3, %v1660_v29  ;;  %v399_v49 = vmax.f32 %v367_v33, 0.0  ;;  %v303_v33 = vld [vmem:[%s1600_s15 + $0xa0] sm:$0xff] }
  0x18   : > { %v426_v43 = vpack.c.bf16 %v396_v34, %v395_v32  ;;  %v427_v44 = vpack.c.bf16 %v398_v36, %v397_v35  ;;  %v400_v50 = vmax.f32 %v368_v37, 0.0  ;;  %v332_v51 = vmul.f32 %v1592_v3, %v1669_v41  ;;  %v302_v32 = vld [vmem:[%s1600_s15 + $0x98] sm:$0xff]  ;;  %v304_v34 = vld [vmem:[%s1600_s15 + $0xa8] sm:$0xff] }
  0x19   : > { %1370 = vmatprep.mubr.msk.bf16.mxu0 %vm456_vm0, %v425_v38  ;;  %v369_v47 = vadd.f32 %v1605_v4, %v330_v39  ;;  %v370_v48 = vadd.f32 %v1605_v4, %v331_v40  ;;  %v333_v52 = vmul.f32 %v1592_v3, %v1672_v42  ;;  %v334_v55 = vmul.f32 %v1592_v3, %v1675_v45 }
  0x1a   : > { %1371 = vmatmul.mubr.msk.bf16.vlgmr.msra.gmra.mrb[0].mxu0 %vm456_vm0, %v426_v43  ;;  %v335_v56 = vmul.f32 %v1592_v3, %v1678_v46  ;;  %v428_v57 = vpack.c.bf16 %v400_v50, %v399_v49  ;;  %v371_v58 = vadd.f32 %v1605_v4, %v332_v51  ;;  %v336_v14 = vmul.f32 %v1592_v3, %v1699_v63 }
  0x1b   : > { %1374 = vmatprep.mubr.msk.bf16.mxu0 %vm456_vm0, %v427_v44  ;;  %v401_v53 = vmax.f32 %v369_v47, 0.0  ;;  %v402_v54 = vmax.f32 %v370_v48, 0.0  ;;  %1403 = vmatpush3.bf16.msra.mxu0 %v1577_v1  ;;  %v372_v59 = vadd.f32 %v1605_v4, %v333_v52  ;;  %v373_v61 = vadd.f32 %v1605_v4, %v334_v55 }
  0x1c   : > { %v374_v62 = vadd.f32 %v1605_v4, %v335_v56  ;;  %v403_v1 = vmax.f32 %v371_v58, 0.0  ;;  %v337_v16 = vmul.f32 %v1592_v3, %v1702_v0  ;;  %v338_v21 = vmul.f32 %v1592_v3, %v299_v8  ;;  %v307_v58 = vld [vmem:[%s1600_s15 + $0xc0] sm:$0xff] }
  0x1d   : > { %v429_v60 = vpack.c.bf16 %v402_v54, %v401_v53  ;;  %v404_v11 = vmax.f32 %v372_v59, 0.0  ;;  %v405_v17 = vmax.f32 %v373_v61, 0.0  ;;  %v339_v22 = vmul.f32 %v1592_v3, %v300_v9  ;;  %v305_v54 = vld [vmem:[%s1600_s15 + $0xb0] sm:$0xff]  ;;  %v308_v59 = vld [vmem:[%s1600_s15 + $0xc8] sm:$0xff] }
  0x1e   : > { %v406_v20 = vmax.f32 %v374_v62, 0.0  ;;  %v375_v24 = vadd.f32 %v1605_v4, %v336_v14  ;;  %v376_v25 = vadd.f32 %v1605_v4, %v337_v16  ;;  %v377_v30 = vadd.f32 %v1605_v4, %v338_v21 }
  0x1f   : > { %v430_v23 = vpack.c.bf16 %v404_v11, %v403_v1  ;;  %v378_v31 = vadd.f32 %v1605_v4, %v339_v22  ;;  %v340_v35 = vmul.f32 %v1592_v3, %v301_v26  ;;  %v341_v38 = vmul.f32 %v1592_v3, %v302_v32 }
  0x20   : > { %v431_v27 = vpack.c.bf16 %v406_v20, %v405_v17  ;;  %v407_v36 = vmax.f32 %v375_v24, 0.0  ;;  %v408_v37 = vmax.f32 %v376_v25, 0.0  ;;  %v342_v39 = vmul.f32 %v1592_v3, %v303_v33  ;;  %v309_v25 = vld [vmem:[%s1600_s15 + $0xd0] sm:$0xff] }
  0x21   : > { %v409_v40 = vmax.f32 %v377_v30, 0.0  ;;  %v410_v43 = vmax.f32 %v378_v31, 0.0  ;;  %v343_v44 = vmul.f32 %v1592_v3, %v304_v34  ;;  %v724_v47 = vpack.c.bf16 %v300_v9, %v299_v8  ;;  %v312_v30 = vld [vmem:[%s1600_s15 + $0xe8] sm:$0xff] }
  0x22   : > { %1375 = vmatmul.mubr.msk.bf16.gmra.mrb[4].mxu0 %vm456_vm0, %v428_v57  ;;  %v725_v48 = vpack.c.bf16 %v302_v32, %v301_v26  ;;  %v379_v49 = vadd.f32 %v1605_v4, %v340_v35  ;;  %v726_v50 = vpack.c.bf16 %v304_v34, %v303_v33  ;;  %v432_v51 = vpack.c.bf16 %v408_v37, %v407_v36  ;;  %v306_v57 = vld [vmem:[%s1600_s15 + $0xb8] sm:$0xff] }
  0x23   : > { %1378 = vmatprep.mubr.msk.bf16.mxu0 %vm456_vm0, %v429_v60  ;;  %1420 = vmatprep.mubr.msk.bf16.mxu1 %vm456_vm0, %v724_v47  ;;  %v380_v52 = vadd.f32 %v1605_v4, %v341_v38  ;;  %v381_v53 = vadd.f32 %v1605_v4, %v342_v39  ;;  %v433_v55 = vpack.c.bf16 %v410_v43, %v409_v40  ;;  %v310_v26 = vld [vmem:[%s1600_s15 + $0xd8] sm:$0xff] }
  0x24   : > { %1421 = vmatmul.mubr.msk.bf16.vlgmr.msra.gmra.mrb[0].mxu1 %vm456_vm0, %v725_v48  ;;  %v382_v56 = vadd.f32 %v1605_v4, %v343_v44  ;;  %v411_v60 = vmax.f32 %v379_v49, 0.0  ;;  %v344_v61 = vmul.f32 %v1592_v3, %v305_v54  ;;  %v345_v9 = vmul.f32 %v1592_v3, %v306_v57 }
  0x25   : > { %1437 = vmatpush3.bf16.msra.mxu1 %v1584_v2  ;;  %1424 = vmatprep.mubr.msk.bf16.mxu1 %vm456_vm0, %v726_v50  ;;  %v412_v62 = vmax.f32 %v380_v52, 0.0  ;;  %v413_v8 = vmax.f32 %v381_v53, 0.0  ;;  %v727_v1 = vpack.c.bf16 %v306_v57, %v305_v54  ;;  %v346_v11 = vmul.f32 %v1592_v3, %v307_v58  ;;  %v313_v50 = vld [vmem:[%s1600_s15 + $0xf0] sm:$0xff] }
  0x26   : > { %v414_v2 = vmax.f32 %v382_v56, 0.0  ;;  %v347_v14 = vmul.f32 %v1592_v3, %v308_v59  ;;  %v728_v16 = vpack.c.bf16 %v308_v59, %v307_v58  ;;  %v383_v17 = vadd.f32 %v1605_v4, %v344_v61 }
  0x27   : > { %v434_v20 = vpack.c.bf16 %v412_v62, %v411_v60  ;;  %v384_v21 = vadd.f32 %v1605_v4, %v345_v9  ;;  %v348_v33 = vmul.f32 %v1592_v3, %v309_v25  ;;  %v349_v34 = vmul.f32 %v1592_v3, %v310_v26 }
  0x28   : > { %v435_v22 = vpack.c.bf16 %v414_v2, %v413_v8  ;;  %v386_v24 = vadd.f32 %v1605_v4, %v347_v14  ;;  %v415_v31 = vmax.f32 %v383_v17, 0.0  ;;  %v729_v35 = vpack.c.bf16 %v310_v26, %v309_v25 }
  0x29   : > { %v416_v32 = vmax.f32 %v384_v21, 0.0  ;;  %v351_v39 = vmul.f32 %v1592_v3, %v312_v30  ;;  %v387_v43 = vadd.f32 %v1605_v4, %v348_v33  ;;  %v388_v44 = vadd.f32 %v1605_v4, %v349_v34 }
  0x2a   : > { %1379 = vmatmul.mubr.msk.bf16.gmra.mrb[8].mxu0 %vm456_vm0, %v430_v23  ;;  %v385_v23 = vadd.f32 %v1605_v4, %v346_v11  ;;  %v418_v37 = vmax.f32 %v386_v24, 0.0  ;;  %v352_v54 = vmul.f32 %v1592_v3, %v313_v50  ;;  %v716_v2 = vpack.c.bf16 %v1612_v6, %v1609_v5 }
  0x2b   : > { %1382 = vmatprep.mubr.msk.bf16.mxu0 %vm456_vm0, %v431_v27  ;;  %v311_v27 = vld [vmem:[%s1600_s15 + $0xe0] sm:$0xff]  ;;  %v436_v40 = vpack.c.bf16 %v416_v32, %v415_v31  ;;  %v390_v49 = vadd.f32 %v1605_v4, %v351_v39  ;;  %v419_v52 = vmax.f32 %v387_v43, 0.0  ;;  %v420_v53 = vmax.f32 %v388_v44, 0.0 }
  0x2c   : > { %1425 = vmatmul.mubr.msk.bf16.gmra.mrb[4].mxu1 %vm456_vm0, %v727_v1  ;;  %v417_v36 = vmax.f32 %v385_v23, 0.0  ;;  %v350_v38 = vmul.f32 %v1592_v3, %v311_v27  ;;  %v391_v59 = vadd.f32 %v1605_v4, %v352_v54  ;;  %v719_v11 = vpack.c.bf16 %v1644_v19, %v1641_v18 }
  0x2d   : > { %1428 = vmatprep.mubr.msk.bf16.mxu1 %vm456_vm0, %v728_v16  ;;  %v422_v57 = vmax.f32 %v390_v49, 0.0  ;;  %v438_v58 = vpack.c.bf16 %v420_v53, %v419_v52  ;;  %v720_v5 = vpack.c.bf16 %v1660_v29, %v1657_v28  ;;  %v721_v6 = vpack.c.bf16 %v1672_v42, %v1669_v41 }
  0x2e   : > { %v437_v47 = vpack.c.bf16 %v418_v37, %v417_v36  ;;  %v389_v48 = vadd.f32 %v1605_v4, %v350_v38  ;;  %v423_v62 = vmax.f32 %v391_v59, 0.0  ;;  %v722_v7 = vpack.c.bf16 %v1678_v46, %v1675_v45 }
  0x2f   : > { %v723_v10 = vpack.c.bf16 %v1702_v0, %v1699_v63 }
  0x30   : > { %v421_v56 = vmax.f32 %v389_v48, 0.0 }
  0x32   : > { %1383 = vmatmul.mubr.msk.bf16.gmra.mrb[12].mxu0 %vm456_vm0, %v432_v51  ;;  %v314_v51 = vld [vmem:[%s1600_s15 + $0xf8] sm:$0xff]  ;;  %v439_v61 = vpack.c.bf16 %v422_v57, %v421_v56 }
  0x33   : > { %1386 = vmatprep.mubr.msk.bf16.mxu0 %vm456_vm0, %v433_v55  ;;  %v353_v55 = vmul.f32 %v1592_v3, %v314_v51  ;;  %v730_v3 = vpack.c.bf16 %v312_v30, %v311_v27  ;;  %v731_v1 = vpack.c.bf16 %v314_v51, %v313_v50 }
  0x34   : > { %1429 = vmatmul.mubr.msk.bf16.gmra.mrb[8].mxu1 %vm456_vm0, %v729_v35 }
  0x35   : > { %v392_v60 = vadd.f32 %v1605_v4, %v353_v55  ;;  %1432 = vmatprep.mubr.msk.bf16.mxu1 %vm456_vm0, %v730_v3  ;;  %v718_v4 = vpack.c.bf16 %v1630_v13, %v1627_v12  ;;  %v1808_v12 = vld [vmem:[%s1904_s4] ss:$0 sm:$0xff] }
  0x37   : > { %v424_v8 = vmax.f32 %v392_v60, 0.0 }
  0x39   : > { %v440_v9 = vpack.c.bf16 %v424_v8, %v423_v62 }
  0x3a   : > { %1387 = vmatmul.mubr.msk.bf16.gmra.mrb[16].mxu0 %vm456_vm0, %v434_v20 }
  0x3b   : > { %1390 = vmatprep.mubr.msk.bf16.mxu0 %vm456_vm0, %v435_v22 }
  0x3c   : > { %1433 = vmatmul.mubr.msk.bf16.gmra.mrb[12].mxu1 %vm456_vm0, %v731_v1 }
  0x42   : > { %1391 = vmatmul.mubr.msk.bf16.gmra.mrb[20].mxu0 %vm456_vm0, %v436_v40 }
  0x43   : > { %1394 = vmatprep.mubr.msk.bf16.mxu0 %vm456_vm0, %v437_v47 }
  0x4a   : > { %1395 = vmatmul.mubr.msk.bf16.gmra.mrb[24].mxu0 %vm456_vm0, %v438_v58 }
  0x4b   : > { %1398 = vmatprep.mubr.msk.bf16.mxu0 %vm456_vm0, %v439_v61 }
  0x52   : > { %1399 = vmatmul.mubr.msk.bf16.gmra.mrb[28].mxu0 %vm456_vm0, %v440_v9 }
  0x53   : > { %1404 = vmatprep.mubr.msk.bf16.mxu0 %vm456_vm0, %v716_v2 }
  0x5a   : > { %1405 = vmatmul.mubr.msk.bf16.vlgmr.msra.gmra.mrb[32].mxu0 %vm456_vm0, %v717_v15 }
  0x5b   : > { %1408 = vmatprep.mubr.msk.bf16.mxu0 %vm456_vm0, %v718_v4 }
  0x62   : > { %1409 = vmatmul.mubr.msk.bf16.gmra.mrb[36].mxu0 %vm456_vm0, %v719_v11 }
  0x63   : > { %1412 = vmatprep.mubr.msk.bf16.mxu0 %vm456_vm0, %v720_v5 }
  0x6a   : > { %1413 = vmatmul.mubr.msk.bf16.gmra.mrb[40].mxu0 %vm456_vm0, %v721_v6 }
  0x6b   : > { %1416 = vmatprep.mubr.msk.bf16.mxu0 %vm456_vm0, %v722_v7 }
  0x72   : > { %1417 = vmatmul.mubr.msk.bf16.gmra.mrb[44].mxu0 %vm456_vm0, %v723_v10 }
  0xed   : > { %v1372_v13 = vpop.f32.mrb[0].mxu0 }
  0xee   : > { %v548_v15 = vadd.f32 %v1372_v13, %v1808_v12  ;;  %v539_v18 = vpop.f32.mrb[1].mxu0 }
  0xef   : > { %v540_v19 = vadd.f32 %v1808_v12, %v539_v18  ;;  %v1373_v28 = vpop.f32.mrb[2].mxu0 }
  0xf0   : > { %v551_v29 = vadd.f32 %v1373_v28, %v1808_v12  ;;  %v542_v41 = vpop.f32.mrb[3].mxu0  ;;  %v668_v45 = vmax.f32 %v548_v15, 0.0 }
  0xf1   : > { %v543_v42 = vadd.f32 %v1808_v12, %v542_v41  ;;  %v666_v63 = vmax.f32 %v540_v19, 0.0 }
  0xf2   : > { %v669_v46 = vmax.f32 %v551_v29, 0.0 }
  0xf3   : > { %v667_v0 = vmax.f32 %v543_v42, 0.0 }
  0xf4   : > { %v699_v14 = vpack.c.bf16 %v669_v46, %v668_v45 }
  0xf5   : > { %v698_v16 = vpack.c.bf16 %v667_v0, %v666_v63  ;;  %v1376_v17 = vpop.f32.mrb[4].mxu0 }
  0xf6   : > { %v564_v20 = vadd.f32 %v1376_v17, %v1808_v12  ;;  %v555_v21 = vpop.f32.mrb[5].mxu0 }
  0xf7   : > { %v556_v22 = vadd.f32 %v1808_v12, %v555_v21  ;;  %v1377_v23 = vpop.f32.mrb[6].mxu0  ;;  %1438 = vmatprep.mubr.msk.bf16.mxu1 %vm456_vm0, %v698_v16 }
  0xf8   : > { %v567_v24 = vadd.f32 %v1377_v23, %v1808_v12  ;;  %v558_v25 = vpop.f32.mrb[7].mxu0  ;;  %1439 = vmatmul.mubr.msk.bf16.vlgmr.msra.gmra.mrb[16].mxu1 %vm456_vm0, %v699_v14  ;;  %v672_v27 = vmax.f32 %v564_v20, 0.0 }
  0xf9   : > { %v559_v26 = vadd.f32 %v1808_v12, %v558_v25  ;;  %v670_v31 = vmax.f32 %v556_v22, 0.0 }
  0xfa   : > { %v673_v30 = vmax.f32 %v567_v24, 0.0 }
  0xfb   : > { %v671_v32 = vmax.f32 %v559_v26, 0.0 }
  0xfc   : > { %v701_v33 = vpack.c.bf16 %v673_v30, %v672_v27 }
  0xfd   : > { %v700_v34 = vpack.c.bf16 %v671_v32, %v670_v31  ;;  %v1380_v35 = vpop.f32.mrb[8].mxu0 }
  0xfe   : > { %v580_v36 = vadd.f32 %v1380_v35, %v1808_v12  ;;  %v571_v37 = vpop.f32.mrb[9].mxu0 }
  0xff   : > { %v572_v38 = vadd.f32 %v1808_v12, %v571_v37  ;;  %v1381_v39 = vpop.f32.mrb[10].mxu0  ;;  %1442 = vmatprep.mubr.msk.bf16.mxu1 %vm456_vm0, %v700_v34 }
 0x100   : > { %v583_v40 = vadd.f32 %v1381_v39, %v1808_v12  ;;  %v574_v43 = vpop.f32.mrb[11].mxu0  ;;  %1443 = vmatmul.mubr.msk.bf16.gmra.mrb[20].mxu1 %vm456_vm0, %v701_v33  ;;  %v676_v47 = vmax.f32 %v580_v36, 0.0 }
 0x101   : > { %v575_v44 = vadd.f32 %v1808_v12, %v574_v43  ;;  %v674_v49 = vmax.f32 %v572_v38, 0.0 }
 0x102   : > { %v677_v48 = vmax.f32 %v583_v40, 0.0 }
 0x103   : > { %v675_v50 = vmax.f32 %v575_v44, 0.0 }
 0x104   : > { %v703_v51 = vpack.c.bf16 %v677_v48, %v676_v47 }
 0x105   : > { %v702_v52 = vpack.c.bf16 %v675_v50, %v674_v49  ;;  %v1384_v53 = vpop.f32.mrb[12].mxu0 }
 0x106   : > { %v596_v54 = vadd.f32 %v1384_v53, %v1808_v12  ;;  %v587_v55 = vpop.f32.mrb[13].mxu0 }
 0x107   : > { %v588_v56 = vadd.f32 %v1808_v12, %v587_v55  ;;  %v1385_v57 = vpop.f32.mrb[14].mxu0  ;;  %1446 = vmatprep.mubr.msk.bf16.mxu1 %vm456_vm0, %v702_v52 }
 0x108   : > { %v599_v58 = vadd.f32 %v1385_v57, %v1808_v12  ;;  %v590_v59 = vpop.f32.mrb[15].mxu0  ;;  %1447 = vmatmul.mubr.msk.bf16.gmra.mrb[24].mxu1 %vm456_vm0, %v703_v51  ;;  %v680_v61 = vmax.f32 %v596_v54, 0.0 }
 0x109   : > { %v591_v60 = vadd.f32 %v1808_v12, %v590_v59  ;;  %v678_v8 = vmax.f32 %v588_v56, 0.0 }
 0x10a   : > { %v681_v62 = vmax.f32 %v599_v58, 0.0 }
 0x10b   : > { %v679_v9 = vmax.f32 %v591_v60, 0.0 }
 0x10c   : > { %v705_v3 = vpack.c.bf16 %v681_v62, %v680_v61 }
 0x10d   : > { %v704_v1 = vpack.c.bf16 %v679_v9, %v678_v8  ;;  %v1388_v2 = vpop.f32.mrb[16].mxu0 }
 0x10e   : > { %v612_v4 = vadd.f32 %v1388_v2, %v1808_v12  ;;  %v603_v11 = vpop.f32.mrb[17].mxu0 }
 0x10f   : > { %v604_v5 = vadd.f32 %v1808_v12, %v603_v11  ;;  %v1389_v6 = vpop.f32.mrb[18].mxu0  ;;  %1450 = vmatprep.mubr.msk.bf16.mxu1 %vm456_vm0, %v704_v1 }
 0x110   : > { %v615_v7 = vadd.f32 %v1389_v6, %v1808_v12  ;;  %v606_v10 = vpop.f32.mrb[19].mxu0  ;;  %1451 = vmatmul.mubr.msk.bf16.gmra.mrb[28].mxu1 %vm456_vm0, %v705_v3  ;;  %v684_v15 = vmax.f32 %v612_v4, 0.0 }
 0x111   : > { %v607_v13 = vadd.f32 %v1808_v12, %v606_v10  ;;  %v682_v19 = vmax.f32 %v604_v5, 0.0 }
 0x112   : > { %v685_v18 = vmax.f32 %v615_v7, 0.0 }
 0x113   : > { %v683_v28 = vmax.f32 %v607_v13, 0.0 }
 0x114   : > { %v707_v29 = vpack.c.bf16 %v685_v18, %v684_v15 }
 0x115   : > { %v706_v41 = vpack.c.bf16 %v683_v28, %v682_v19  ;;  %v1392_v42 = vpop.f32.mrb[20].mxu0 }
 0x116   : > { %v628_v45 = vadd.f32 %v1392_v42, %v1808_v12  ;;  %v619_v46 = vpop.f32.mrb[21].mxu0 }
 0x117   : > { %v620_v63 = vadd.f32 %v1808_v12, %v619_v46  ;;  %v1393_v0 = vpop.f32.mrb[22].mxu0  ;;  %1454 = vmatprep.mubr.msk.bf16.mxu1 %vm456_vm0, %v706_v41 }
 0x118   : > { %v631_v14 = vadd.f32 %v1393_v0, %v1808_v12  ;;  %v622_v16 = vpop.f32.mrb[23].mxu0  ;;  %1455 = vmatmul.mubr.msk.bf16.gmra.mrb[0].mxu1 %vm456_vm0, %v707_v29  ;;  %v688_v20 = vmax.f32 %v628_v45, 0.0 }
 0x119   : > { %v623_v17 = vadd.f32 %v1808_v12, %v622_v16  ;;  %v686_v22 = vmax.f32 %v620_v63, 0.0 }
 0x11a   : > { %v689_v21 = vmax.f32 %v631_v14, 0.0 }
 0x11b   : > { %v687_v23 = vmax.f32 %v623_v17, 0.0 }
 0x11c   : > { %v709_v24 = vpack.c.bf16 %v689_v21, %v688_v20 }
 0x11d   : > { %v708_v25 = vpack.c.bf16 %v687_v23, %v686_v22  ;;  %v1396_v26 = vpop.f32.mrb[24].mxu0 }
 0x11e   : > { %v644_v27 = vadd.f32 %v1396_v26, %v1808_v12  ;;  %v635_v30 = vpop.f32.mrb[25].mxu0 }
 0x11f   : > { %v636_v31 = vadd.f32 %v1808_v12, %v635_v30  ;;  %v1397_v32 = vpop.f32.mrb[26].mxu0  ;;  %1458 = vmatprep.mubr.msk.bf16.mxu1 %vm456_vm0, %v708_v25 }
 0x120   : > { %v647_v33 = vadd.f32 %v1397_v32, %v1808_v12  ;;  %v638_v34 = vpop.f32.mrb[27].mxu0  ;;  %1459 = vmatmul.mubr.msk.bf16.gmra.mrb[4].mxu1 %vm456_vm0, %v709_v24  ;;  %v692_v36 = vmax.f32 %v644_v27, 0.0 }
 0x121   : > { %v639_v35 = vadd.f32 %v1808_v12, %v638_v34  ;;  %v690_v38 = vmax.f32 %v636_v31, 0.0 }
 0x122   : > { %v693_v37 = vmax.f32 %v647_v33, 0.0 }
 0x123   : > { %v691_v39 = vmax.f32 %v639_v35, 0.0 }
 0x124   : > { %v711_v40 = vpack.c.bf16 %v693_v37, %v692_v36 }
 0x125   : > { %v710_v43 = vpack.c.bf16 %v691_v39, %v690_v38  ;;  %v1400_v44 = vpop.f32.mrb[28].mxu0 }
 0x126   : > { %v660_v47 = vadd.f32 %v1400_v44, %v1808_v12  ;;  %v651_v48 = vpop.f32.mrb[29].mxu0 }
 0x127   : > { %v652_v49 = vadd.f32 %v1808_v12, %v651_v48  ;;  %v1401_v50 = vpop.f32.mrb[30].mxu0  ;;  %1462 = vmatprep.mubr.msk.bf16.mxu1 %vm456_vm0, %v710_v43 }
 0x128   : > { %v663_v51 = vadd.f32 %v1401_v50, %v1808_v12  ;;  %v654_v52 = vpop.f32.mrb[31].mxu0  ;;  %1463 = vmatmul.mubr.msk.bf16.gmra.mrb[8].mxu1 %vm456_vm0, %v711_v40  ;;  %v696_v54 = vmax.f32 %v660_v47, 0.0 }
 0x129   : > { %v655_v53 = vadd.f32 %v1808_v12, %v654_v52  ;;  %v694_v56 = vmax.f32 %v652_v49, 0.0 }
 0x12a   : > { %v697_v55 = vmax.f32 %v663_v51, 0.0 }
 0x12b   : > { %v695_v57 = vmax.f32 %v655_v53, 0.0 }
 0x12c   : > { %v713_v58 = vpack.c.bf16 %v697_v55, %v696_v54 }
 0x12d   : > { %v712_v59 = vpack.c.bf16 %v695_v57, %v694_v56  ;;  %v1406_v60 = vpop.f32.mrb[32].mxu0 }
 0x12e   : > { %v822_v61 = vpop.f32.mrb[33].mxu0 }
 0x12f   : > { %1466 = vmatprep.mubr.msk.bf16.mxu1 %vm456_vm0, %v712_v59  ;;  %v1407_v62 = vpop.f32.mrb[34].mxu0 }
 0x130   : > { %1467 = vmatmul.mubr.msk.bf16.gmra.mrb[12].mxu1 %vm456_vm0, %v713_v58  ;;  %v825_v8 = vpop.f32.mrb[35].mxu0 }
 0x135   : > { %v1410_v9 = vpop.f32.mrb[36].mxu0 }
 0x136   : > { %v838_v3 = vpop.f32.mrb[37].mxu0 }
 0x137   : > { %v1411_v1 = vpop.f32.mrb[38].mxu0 }
 0x138   : > { %v841_v2 = vpop.f32.mrb[39].mxu0 }
 0x13d   : > { %v1414_v12 = vpop.f32.mrb[40].mxu0 }
 0x13e   : > { %v854_v4 = vpop.f32.mrb[41].mxu0 }
 0x13f   : > { %v1415_v11 = vpop.f32.mrb[42].mxu0 }
 0x140   : > { %v857_v5 = vpop.f32.mrb[43].mxu0 }
 0x145   : > { %v1418_v6 = vpop.f32.mrb[44].mxu0 }
 0x146   : > { %v870_v7 = vpop.f32.mrb[45].mxu0 }
 0x147   : > { %v1419_v10 = vpop.f32.mrb[46].mxu0 }
 0x148   : > { %v873_v13 = vpop.f32.mrb[47].mxu0 }
 0x1cb   : > { %v1440_v15 = vpop.f32.mrb[16].mxu1 }
 0x1cc   : > { %v1046_v18 = vadd.f32 %v1440_v15, %v1406_v60  ;;  %v1037_v19 = vpop.f32.mrb[17].mxu1 }
 0x1cd   : > { %v1038_v28 = vadd.f32 %v1037_v19, %v822_v61  ;;  %v1441_v29 = vpop.f32.mrb[18].mxu1 }
 0x1ce   : > { %1166 = vst [vmem:[%s1863_s22 + $0x10] sm:$0xff] %v1046_v18  ;;  %v1049_v41 = vadd.f32 %v1441_v29, %v1407_v62  ;;  %v1040_v42 = vpop.f32.mrb[19].mxu1 }
 0x1cf   : > { %1164 = vst [vmem:[%s1863_s22] sm:$0xff] %v1038_v28  ;;  %v1041_v45 = vadd.f32 %v1040_v42, %v825_v8 }
 0x1d0   : > { %1167 = vst [vmem:[%s1863_s22 + $0x18] sm:$0xff] %v1049_v41 }
 0x1d1   : > { %1165 = vst [vmem:[%s1863_s22 + $0x8] sm:$0xff] %v1041_v45 }
 0x1d3   : > { %v1444_v46 = vpop.f32.mrb[20].mxu1 }
 0x1d4   : > { %v1062_v63 = vadd.f32 %v1444_v46, %v1410_v9  ;;  %v1053_v0 = vpop.f32.mrb[21].mxu1 }
 0x1d5   : > { %v1054_v14 = vadd.f32 %v1053_v0, %v838_v3  ;;  %v1445_v16 = vpop.f32.mrb[22].mxu1 }
 0x1d6   : > { %1170 = vst [vmem:[%s1863_s22 + $0x30] sm:$0xff] %v1062_v63  ;;  %v1065_v17 = vadd.f32 %v1445_v16, %v1411_v1  ;;  %v1056_v20 = vpop.f32.mrb[23].mxu1 }
 0x1d7   : > { %1168 = vst [vmem:[%s1863_s22 + $0x20] sm:$0xff] %v1054_v14  ;;  %v1057_v21 = vadd.f32 %v1056_v20, %v841_v2 }
 0x1d8   : > { %1171 = vst [vmem:[%s1863_s22 + $0x38] sm:$0xff] %v1065_v17 }
 0x1d9   : > { %1169 = vst [vmem:[%s1863_s22 + $0x28] sm:$0xff] %v1057_v21 }
 0x1db   : > { %v1448_v22 = vpop.f32.mrb[24].mxu1 }
 0x1dc   : > { %v1078_v23 = vadd.f32 %v1448_v22, %v1414_v12  ;;  %v1069_v24 = vpop.f32.mrb[25].mxu1 }
 0x1dd   : > { %v1070_v25 = vadd.f32 %v1069_v24, %v854_v4  ;;  %v1449_v26 = vpop.f32.mrb[26].mxu1 }
 0x1de   : > { %1174 = vst [vmem:[%s1863_s22 + $0x50] sm:$0xff] %v1078_v23  ;;  %v1081_v27 = vadd.f32 %v1449_v26, %v1415_v11  ;;  %v1072_v30 = vpop.f32.mrb[27].mxu1 }
 0x1df   : > { %1172 = vst [vmem:[%s1863_s22 + $0x40] sm:$0xff] %v1070_v25  ;;  %v1073_v31 = vadd.f32 %v1072_v30, %v857_v5 }
 0x1e0   : > { %1175 = vst [vmem:[%s1863_s22 + $0x58] sm:$0xff] %v1081_v27 }
 0x1e1   : > { %1173 = vst [vmem:[%s1863_s22 + $0x48] sm:$0xff] %v1073_v31 }
 0x1e3   : > { %v1452_v32 = vpop.f32.mrb[28].mxu1 }
 0x1e4   : > { %v1094_v33 = vadd.f32 %v1452_v32, %v1418_v6  ;;  %v1085_v34 = vpop.f32.mrb[29].mxu1 }
 0x1e5   : > { %v1086_v35 = vadd.f32 %v1085_v34, %v870_v7  ;;  %v1453_v36 = vpop.f32.mrb[30].mxu1 }
 0x1e6   : > { %1178 = vst [vmem:[%s1863_s22 + $0x70] sm:$0xff] %v1094_v33  ;;  %v1097_v37 = vadd.f32 %v1453_v36, %v1419_v10  ;;  %v1088_v38 = vpop.f32.mrb[31].mxu1 }
 0x1e7   : > { %1176 = vst [vmem:[%s1863_s22 + $0x60] sm:$0xff] %v1086_v35  ;;  %v1089_v39 = vadd.f32 %v1088_v38, %v873_v13 }
 0x1e8   : > { %1179 = vst [vmem:[%s1863_s22 + $0x78] sm:$0xff] %v1097_v37 }
 0x1e9   : > { %1177 = vst [vmem:[%s1863_s22 + $0x68] sm:$0xff] %v1089_v39 }
 0x1eb   : > { %v1456_v40 = vpop.f32.mrb[0].mxu1 }
 0x1ec   : > { %1182 = vst [vmem:[%s1863_s22 + $0x90] sm:$0xff] %v1456_v40  ;;  %v1101_v43 = vpop.f32.mrb[1].mxu1 }
 0x1ed   : > { %1180 = vst [vmem:[%s1863_s22 + $0x80] sm:$0xff] %v1101_v43  ;;  %v1457_v44 = vpop.f32.mrb[2].mxu1 }
 0x1ee   : > { %1183 = vst [vmem:[%s1863_s22 + $0x98] sm:$0xff] %v1457_v44  ;;  %v1104_v47 = vpop.f32.mrb[3].mxu1 }
 0x1ef   : > { %1181 = vst [vmem:[%s1863_s22 + $0x88] sm:$0xff] %v1104_v47 }
 0x1f3   : > { %v1460_v48 = vpop.f32.mrb[4].mxu1 }
 0x1f4   : > { %1186 = vst [vmem:[%s1863_s22 + $0xb0] sm:$0xff] %v1460_v48  ;;  %v1117_v49 = vpop.f32.mrb[5].mxu1 }
 0x1f5   : > { %1184 = vst [vmem:[%s1863_s22 + $0xa0] sm:$0xff] %v1117_v49  ;;  %v1461_v50 = vpop.f32.mrb[6].mxu1 }
 0x1f6   : > { %1187 = vst [vmem:[%s1863_s22 + $0xb8] sm:$0xff] %v1461_v50  ;;  %v1120_v51 = vpop.f32.mrb[7].mxu1 }
 0x1f7   : > { %1185 = vst [vmem:[%s1863_s22 + $0xa8] sm:$0xff] %v1120_v51 }
 0x1fb   : > { %v1464_v52 = vpop.f32.mrb[8].mxu1 }
 0x1fc   : > { %1190 = vst [vmem:[%s1863_s22 + $0xd0] sm:$0xff] %v1464_v52  ;;  %v1133_v53 = vpop.f32.mrb[9].mxu1 }
 0x1fd   : > { %1188 = vst [vmem:[%s1863_s22 + $0xc0] sm:$0xff] %v1133_v53  ;;  %v1465_v54 = vpop.f32.mrb[10].mxu1 }
 0x1fe   : > { %1191 = vst [vmem:[%s1863_s22 + $0xd8] sm:$0xff] %v1465_v54  ;;  %v1136_v55 = vpop.f32.mrb[11].mxu1 }
 0x1ff   : > { %1189 = vst [vmem:[%s1863_s22 + $0xc8] sm:$0xff] %v1136_v55 }
 0x203   : > { %v1468_v56 = vpop.f32.mrb[12].mxu1 }
 0x204   : > { %1194 = vst [vmem:[%s1863_s22 + $0xf0] sm:$0xff] %v1468_v56  ;;  %v1149_v57 = vpop.f32.mrb[13].mxu1 }
 0x205   : > { %1192 = vst [vmem:[%s1863_s22 + $0xe0] sm:$0xff] %v1149_v57  ;;  %v1469_v58 = vpop.f32.mrb[14].mxu1 }
 0x206   : > { %1195 = vst [vmem:[%s1863_s22 + $0xf8] sm:$0xff] %v1469_v58  ;;  %v1152_v59 = vpop.f32.mrb[15].mxu1 }
 0x207   : > { %1193 = vst [vmem:[%s1863_s22 + $0xe8] sm:$0xff] %v1152_v59 }
 0x208 PF: > { %s17_s24 = sadd.s32 1, %s1521_s24  }
 0x209   : > { %p14_p4 = scmp.ge.s32.totalorder %s17_s24, 4  }
 0x20b   :  { %16 = sbr.rel (!%p14_p4) target bundleno = 1 (0x1), region = 78 }

// kernel: forward.9
= control target key start
LH: loop header
LB: loop body
LE: loop exit
PB: predicated region body
PF: predicated region fallthrough
CT: control target
= control target key end

     0   :  { %s932_s9 = smov 0   ;;  %s1123_s0 = inlined_call_operand.vmem [shape: f32[2048,8], index: 0, kind: input, shape index: {}]   ;;  %s1124_s1 = inlined_call_operand.vmem [shape: bf16[8,128], index: 1, kind: input, shape index: {}]   ;;  %s1125_s2 = inlined_call_operand.vmem [shape: f32[2048,128], index: 2, kind: output, shape index: {}]  }
   0x1 LB: > { %s755_s10 = sadd.s32 4294967295, %s915_s9   ;;  %p759_p0 = scmp.ge.s32.totalorder %s915_s9, 1  ;;  %s915_s9 = sphi %s932_s9, %s12_s9  }
   0x2   : > { %p113_p1 = scmp.lt.s32.totalorder %s915_s9, 5 }
   0x4   : > { %p114_p2 = pnand %p759_p0, %p113_p1 }
   0x5   : > { %v244_v0 = vld [vmem:[%s1124_s1] sm:$0xf] (!%p114_p2)  ;;  %vm342_vm0 = vcmask (!%p114_p2), 1043456   ;;  %s760_s13 = sshll.u32 (!%p114_p2), %s755_s10, 6  ;;  %vm245_vm1 = vcmask (!%p114_p2), 64512  }
   0x6   : > { %117 = sbr.rel (%p114_p2) target bundleno = 293 (0x125), region = 28  ;;  %899 = vmatprep.subr.msk.bf16.mxu0 (!%p114_p2), %vm342_vm0, %v244_v0  ;;  %900 = vmatprep.subr.msk.bf16.mxu1 (!%p114_p2), %vm342_vm0, %v244_v0  ;;  %v344_v1 = vsel (!%p114_p2), %vm342_vm0, %v244_v0, 0  ;;  %p136_p3 = scmp.lt.s32.totalorder (!%p114_p2), %s760_s13, 255 }
   0x7   : > { %832 = vmatpush3.bf16.msra.mxu0 (!%p114_p2), %v344_v1  ;;  %898 = vmatpush3.bf16.msra.mxu1 (!%p114_p2), %v344_v1 }
   0xd   : > { %s1127_s13 = smov (!%p136_p3, %s760_s13), 255 }
   0xe   : > { %s761_s14 = sshll.u32 %s1127_s13, 3 }
   0xf   : > { %s951_s17 = scalar_lea.vmem %s1123_s0, %s761_s14  ;;  %s1054_s20 = scalar_lea.vmem %s1125_s2, %s761_s14 }
  0x10   : > { %v148_v2 = vld [vmem:[%s951_s17] sm:$0xff]  ;;  %v149_v3 = vld [vmem:[%s951_s17 + $0x8] sm:$0xff]  ;;  %v150_v7 = vld [vmem:[%s951_s17 + $0x10] sm:$0xff] }
  0x11   : > { %v180_v4 = vld [vmem:[%s951_s17 + $0x100] sm:$0xff]  ;;  %v212_v5 = vpack.c.bf16 %v149_v3, %v148_v2  ;;  %v181_v6 = vld [vmem:[%s951_s17 + $0x108] sm:$0xff]  ;;  %v151_v8 = vld [vmem:[%s951_s17 + $0x18] sm:$0xff] }
  0x12   : > { %v228_v9 = vpack.c.bf16 %v181_v6, %v180_v4  ;;  %v213_v10 = vpack.c.bf16 %v151_v8, %v150_v7  ;;  %v182_v11 = vld [vmem:[%s951_s17 + $0x110] sm:$0xff]  ;;  %v183_v12 = vld [vmem:[%s951_s17 + $0x118] sm:$0xff]  ;;  %v152_v13 = vld [vmem:[%s951_s17 + $0x20] sm:$0xff] }
  0x13   : > { %833 = vmatprep.mubr.msk.bf16.mxu0 %vm245_vm1, %v212_v5  ;;  %v229_v14 = vpack.c.bf16 %v183_v12, %v182_v11  ;;  %v153_v15 = vld [vmem:[%s951_s17 + $0x28] sm:$0xff]  ;;  %v184_v16 = vld [vmem:[%s951_s17 + $0x120] sm:$0xff]  ;;  %v154_v20 = vld [vmem:[%s951_s17 + $0x30] sm:$0xff] }
  0x14   : > { %v185_v17 = vld [vmem:[%s951_s17 + $0x128] sm:$0xff]  ;;  %865 = vmatprep.mubr.msk.bf16.mxu1 %vm245_vm1, %v228_v9  ;;  %834 = vmatmul.mubr.msk.bf16.vlgmr.msra.gmra.mrb[0].mxu0 %vm245_vm1, %v213_v10  ;;  %v214_v18 = vpack.c.bf16 %v153_v15, %v152_v13  ;;  %v155_v21 = vld [vmem:[%s951_s17 + $0x38] sm:$0xff]  ;;  %v186_v22 = vld [vmem:[%s951_s17 + $0x130] sm:$0xff] }
  0x15   : > { %v230_v19 = vpack.c.bf16 %v185_v17, %v184_v16  ;;  %866 = vmatmul.mubr.msk.bf16.vlgmr.msra.gmra.mrb[0].mxu1 %vm245_vm1, %v229_v14  ;;  %v187_v23 = vld [vmem:[%s951_s17 + $0x138] sm:$0xff]  ;;  %v156_v24 = vld [vmem:[%s951_s17 + $0x40] sm:$0xff]  ;;  %v157_v25 = vld [vmem:[%s951_s17 + $0x48] sm:$0xff]  ;;  %v215_v28 = vpack.c.bf16 %v155_v21, %v154_v20 }
  0x16   : > { %837 = vmatprep.mubr.msk.bf16.mxu0 %vm245_vm1, %v214_v18  ;;  %v188_v26 = vld [vmem:[%s951_s17 + $0x140] sm:$0xff]  ;;  %v189_v27 = vld [vmem:[%s951_s17 + $0x148] sm:$0xff]  ;;  %v231_v29 = vpack.c.bf16 %v187_v23, %v186_v22  ;;  %v216_v30 = vpack.c.bf16 %v157_v25, %v156_v24  ;;  %v158_v32 = vld [vmem:[%s951_s17 + $0x50] sm:$0xff] }
  0x17   : > { %869 = vmatprep.mubr.msk.bf16.mxu1 %vm245_vm1, %v230_v19  ;;  %v232_v31 = vpack.c.bf16 %v189_v27, %v188_v26  ;;  %v159_v33 = vld [vmem:[%s951_s17 + $0x58] sm:$0xff]  ;;  %v190_v34 = vld [vmem:[%s951_s17 + $0x150] sm:$0xff]  ;;  %v160_v36 = vld [vmem:[%s951_s17 + $0x60] sm:$0xff] }
  0x18   : > { %v191_v35 = vld [vmem:[%s951_s17 + $0x158] sm:$0xff]  ;;  %v161_v37 = vld [vmem:[%s951_s17 + $0x68] sm:$0xff]  ;;  %v192_v38 = vld [vmem:[%s951_s17 + $0x160] sm:$0xff]  ;;  %v217_v40 = vpack.c.bf16 %v159_v33, %v158_v32 }
  0x19   : > { %v193_v39 = vld [vmem:[%s951_s17 + $0x168] sm:$0xff]  ;;  %v233_v41 = vpack.c.bf16 %v191_v35, %v190_v34  ;;  %v218_v42 = vpack.c.bf16 %v161_v37, %v160_v36  ;;  %v162_v44 = vld [vmem:[%s951_s17 + $0x70] sm:$0xff]  ;;  %v163_v45 = vld [vmem:[%s951_s17 + $0x78] sm:$0xff] }
  0x1a   : > { %v234_v43 = vpack.c.bf16 %v193_v39, %v192_v38  ;;  %v194_v46 = vld [vmem:[%s951_s17 + $0x170] sm:$0xff]  ;;  %v195_v47 = vld [vmem:[%s951_s17 + $0x178] sm:$0xff]  ;;  %v164_v48 = vld [vmem:[%s951_s17 + $0x80] sm:$0xff]  ;;  %v219_v52 = vpack.c.bf16 %v163_v45, %v162_v44 }
  0x1b   : > { %v165_v49 = vld [vmem:[%s951_s17 + $0x88] sm:$0xff]  ;;  %v196_v50 = vld [vmem:[%s951_s17 + $0x180] sm:$0xff]  ;;  %v235_v53 = vpack.c.bf16 %v195_v47, %v194_v46  ;;  %v166_v56 = vld [vmem:[%s951_s17 + $0x90] sm:$0xff] }
  0x1c   : > { %838 = vmatmul.mubr.msk.bf16.gmra.mrb[4].mxu0 %vm245_vm1, %v215_v28  ;;  %v197_v51 = vld [vmem:[%s951_s17 + $0x188] sm:$0xff]  ;;  %v220_v54 = vpack.c.bf16 %v165_v49, %v164_v48  ;;  %v167_v57 = vld [vmem:[%s951_s17 + $0x98] sm:$0xff]  ;;  %v198_v58 = vld [vmem:[%s951_s17 + $0x190] sm:$0xff] }
  0x1d   : > { %870 = vmatmul.mubr.msk.bf16.gmra.mrb[4].mxu1 %vm245_vm1, %v231_v29  ;;  %841 = vmatprep.mubr.msk.bf16.mxu0 %vm245_vm1, %v216_v30  ;;  %v236_v55 = vpack.c.bf16 %v197_v51, %v196_v50  ;;  %v199_v59 = vld [vmem:[%s951_s17 + $0x198] sm:$0xff]  ;;  %v168_v60 = vld [vmem:[%s951_s17 + $0xa0] sm:$0xff]  ;;  %v169_v61 = vld [vmem:[%s951_s17 + $0xa8] sm:$0xff]  ;;  %v221_v0 = vpack.c.bf16 %v167_v57, %v166_v56 }
  0x1e   : > { %873 = vmatprep.mubr.msk.bf16.mxu1 %vm245_vm1, %v232_v31  ;;  %v200_v62 = vld [vmem:[%s951_s17 + $0x1a0] sm:$0xff]  ;;  %v201_v63 = vld [vmem:[%s951_s17 + $0x1a8] sm:$0xff]  ;;  %v237_v1 = vpack.c.bf16 %v199_v59, %v198_v58  ;;  %v222_v2 = vpack.c.bf16 %v169_v61, %v168_v60  ;;  %v170_v4 = vld [vmem:[%s951_s17 + $0xb0] sm:$0xff] }
  0x1f   : > { %v238_v3 = vpack.c.bf16 %v201_v63, %v200_v62  ;;  %v171_v5 = vld [vmem:[%s951_s17 + $0xb8] sm:$0xff]  ;;  %v202_v6 = vld [vmem:[%s951_s17 + $0x1b0] sm:$0xff]  ;;  %v172_v8 = vld [vmem:[%s951_s17 + $0xc0] sm:$0xff] }
  0x20   : > { %v203_v7 = vld [vmem:[%s951_s17 + $0x1b8] sm:$0xff]  ;;  %v173_v9 = vld [vmem:[%s951_s17 + $0xc8] sm:$0xff]  ;;  %v204_v10 = vld [vmem:[%s951_s17 + $0x1c0] sm:$0xff]  ;;  %v223_v12 = vpack.c.bf16 %v171_v5, %v170_v4 }
  0x21   : > { %v205_v11 = vld [vmem:[%s951_s17 + $0x1c8] sm:$0xff]  ;;  %v239_v13 = vpack.c.bf16 %v203_v7, %v202_v6  ;;  %v224_v14 = vpack.c.bf16 %v173_v9, %v172_v8  ;;  %v174_v16 = vld [vmem:[%s951_s17 + $0xd0] sm:$0xff]  ;;  %v175_v17 = vld [vmem:[%s951_s17 + $0xd8] sm:$0xff] }
  0x22   : > { %v240_v15 = vpack.c.bf16 %v205_v11, %v204_v10  ;;  %v206_v18 = vld [vmem:[%s951_s17 + $0x1d0] sm:$0xff]  ;;  %v207_v19 = vld [vmem:[%s951_s17 + $0x1d8] sm:$0xff]  ;;  %v176_v20 = vld [vmem:[%s951_s17 + $0xe0] sm:$0xff]  ;;  %v225_v24 = vpack.c.bf16 %v175_v17, %v174_v16 }
  0x23   : > { %v177_v21 = vld [vmem:[%s951_s17 + $0xe8] sm:$0xff]  ;;  %v208_v22 = vld [vmem:[%s951_s17 + $0x1e0] sm:$0xff]  ;;  %v241_v25 = vpack.c.bf16 %v207_v19, %v206_v18  ;;  %v178_v28 = vld [vmem:[%s951_s17 + $0xf0] sm:$0xff] }
  0x24   : > { %842 = vmatmul.mubr.msk.bf16.gmra.mrb[8].mxu0 %vm245_vm1, %v217_v40  ;;  %v209_v23 = vld [vmem:[%s951_s17 + $0x1e8] sm:$0xff]  ;;  %v226_v26 = vpack.c.bf16 %v177_v21, %v176_v20  ;;  %v179_v29 = vld [vmem:[%s951_s17 + $0xf8] sm:$0xff]  ;;  %v210_v30 = vld [vmem:[%s951_s17 + $0x1f0] sm:$0xff] }
  0x25   : > { %874 = vmatmul.mubr.msk.bf16.gmra.mrb[8].mxu1 %vm245_vm1, %v233_v41  ;;  %845 = vmatprep.mubr.msk.bf16.mxu0 %vm245_vm1, %v218_v42  ;;  %v242_v27 = vpack.c.bf16 %v209_v23, %v208_v22  ;;  %v211_v31 = vld [vmem:[%s951_s17 + $0x1f8] sm:$0xff]  ;;  %v227_v32 = vpack.c.bf16 %v179_v29, %v178_v28 }
  0x26   : > { %877 = vmatprep.mubr.msk.bf16.mxu1 %vm245_vm1, %v234_v43  ;;  %v243_v33 = vpack.c.bf16 %v211_v31, %v210_v30 }
  0x2c   : > { %846 = vmatmul.mubr.msk.bf16.gmra.mrb[12].mxu0 %vm245_vm1, %v219_v52 }
  0x2d   : > { %878 = vmatmul.mubr.msk.bf16.gmra.mrb[12].mxu1 %vm245_vm1, %v235_v53  ;;  %849 = vmatprep.mubr.msk.bf16.mxu0 %vm245_vm1, %v220_v54 }
  0x2e   : > { %881 = vmatprep.mubr.msk.bf16.mxu1 %vm245_vm1, %v236_v55 }
  0x34   : > { %850 = vmatmul.mubr.msk.bf16.gmra.mrb[16].mxu0 %vm245_vm1, %v221_v0 }
  0x35   : > { %882 = vmatmul.mubr.msk.bf16.gmra.mrb[16].mxu1 %vm245_vm1, %v237_v1  ;;  %853 = vmatprep.mubr.msk.bf16.mxu0 %vm245_vm1, %v222_v2 }
  0x36   : > { %885 = vmatprep.mubr.msk.bf16.mxu1 %vm245_vm1, %v238_v3 }
  0x3c   : > { %854 = vmatmul.mubr.msk.bf16.gmra.mrb[20].mxu0 %vm245_vm1, %v223_v12 }
  0x3d   : > { %886 = vmatmul.mubr.msk.bf16.gmra.mrb[20].mxu1 %vm245_vm1, %v239_v13  ;;  %857 = vmatprep.mubr.msk.bf16.mxu0 %vm245_vm1, %v224_v14 }
  0x3e   : > { %889 = vmatprep.mubr.msk.bf16.mxu1 %vm245_vm1, %v240_v15 }
  0x44   : > { %858 = vmatmul.mubr.msk.bf16.gmra.mrb[24].mxu0 %vm245_vm1, %v225_v24 }
  0x45   : > { %890 = vmatmul.mubr.msk.bf16.gmra.mrb[24].mxu1 %vm245_vm1, %v241_v25  ;;  %861 = vmatprep.mubr.msk.bf16.mxu0 %vm245_vm1, %v226_v26 }
  0x46   : > { %893 = vmatprep.mubr.msk.bf16.mxu1 %vm245_vm1, %v242_v27 }
  0x4c   : > { %862 = vmatmul.mubr.msk.bf16.gmra.mrb[28].mxu0 %vm245_vm1, %v227_v32 }
  0x4d   : > { %894 = vmatmul.mubr.msk.bf16.gmra.mrb[28].mxu1 %vm245_vm1, %v243_v33 }
  0xe7   : > { %v835_v34 = vpop.f32.mrb[0].mxu0 }
  0xe8   : > { %637 = vst [vmem:[%s1054_s20 + $0x10] sm:$0xff] %v835_v34  ;;  %v867_v35 = vpop.f32.mrb[0].mxu1  ;;  %v380_v36 = vpop.f32.mrb[1].mxu0 }
  0xe9   : > { %669 = vst [vmem:[%s1054_s20 + $0x110] sm:$0xff] %v867_v35  ;;  %635 = vst [vmem:[%s1054_s20] sm:$0xff] %v380_v36  ;;  %v508_v37 = vpop.f32.mrb[1].mxu1  ;;  %v836_v38 = vpop.f32.mrb[2].mxu0 }
  0xea   : > { %667 = vst [vmem:[%s1054_s20 + $0x100] sm:$0xff] %v508_v37  ;;  %638 = vst [vmem:[%s1054_s20 + $0x18] sm:$0xff] %v836_v38  ;;  %v868_v39 = vpop.f32.mrb[2].mxu1  ;;  %v383_v40 = vpop.f32.mrb[3].mxu0 }
  0xeb   : > { %670 = vst [vmem:[%s1054_s20 + $0x118] sm:$0xff] %v868_v39  ;;  %636 = vst [vmem:[%s1054_s20 + $0x8] sm:$0xff] %v383_v40  ;;  %v511_v41 = vpop.f32.mrb[3].mxu1 }
  0xec   : > { %668 = vst [vmem:[%s1054_s20 + $0x108] sm:$0xff] %v511_v41 }
  0xef   : > { %v839_v42 = vpop.f32.mrb[4].mxu0 }
  0xf0   : > { %641 = vst [vmem:[%s1054_s20 + $0x30] sm:$0xff] %v839_v42  ;;  %v871_v43 = vpop.f32.mrb[4].mxu1  ;;  %v396_v44 = vpop.f32.mrb[5].mxu0 }
  0xf1   : > { %673 = vst [vmem:[%s1054_s20 + $0x130] sm:$0xff] %v871_v43  ;;  %639 = vst [vmem:[%s1054_s20 + $0x20] sm:$0xff] %v396_v44  ;;  %v524_v45 = vpop.f32.mrb[5].mxu1  ;;  %v840_v46 = vpop.f32.mrb[6].mxu0 }
  0xf2   : > { %671 = vst [vmem:[%s1054_s20 + $0x120] sm:$0xff] %v524_v45  ;;  %642 = vst [vmem:[%s1054_s20 + $0x38] sm:$0xff] %v840_v46  ;;  %v872_v47 = vpop.f32.mrb[6].mxu1  ;;  %v399_v48 = vpop.f32.mrb[7].mxu0 }
  0xf3   : > { %674 = vst [vmem:[%s1054_s20 + $0x138] sm:$0xff] %v872_v47  ;;  %640 = vst [vmem:[%s1054_s20 + $0x28] sm:$0xff] %v399_v48  ;;  %v527_v49 = vpop.f32.mrb[7].mxu1 }
  0xf4   : > { %672 = vst [vmem:[%s1054_s20 + $0x128] sm:$0xff] %v527_v49 }
  0xf7   : > { %v843_v50 = vpop.f32.mrb[8].mxu0 }
  0xf8   : > { %645 = vst [vmem:[%s1054_s20 + $0x50] sm:$0xff] %v843_v50  ;;  %v875_v51 = vpop.f32.mrb[8].mxu1  ;;  %v412_v52 = vpop.f32.mrb[9].mxu0 }
  0xf9   : > { %677 = vst [vmem:[%s1054_s20 + $0x150] sm:$0xff] %v875_v51  ;;  %643 = vst [vmem:[%s1054_s20 + $0x40] sm:$0xff] %v412_v52  ;;  %v540_v53 = vpop.f32.mrb[9].mxu1  ;;  %v844_v54 = vpop.f32.mrb[10].mxu0 }
  0xfa   : > { %675 = vst [vmem:[%s1054_s20 + $0x140] sm:$0xff] %v540_v53  ;;  %646 = vst [vmem:[%s1054_s20 + $0x58] sm:$0xff] %v844_v54  ;;  %v876_v55 = vpop.f32.mrb[10].mxu1  ;;  %v415_v56 = vpop.f32.mrb[11].mxu0 }
  0xfb   : > { %678 = vst [vmem:[%s1054_s20 + $0x158] sm:$0xff] %v876_v55  ;;  %644 = vst [vmem:[%s1054_s20 + $0x48] sm:$0xff] %v415_v56  ;;  %v543_v57 = vpop.f32.mrb[11].mxu1 }
  0xfc   : > { %676 = vst [vmem:[%s1054_s20 + $0x148] sm:$0xff] %v543_v57 }
  0xff   : > { %v847_v58 = vpop.f32.mrb[12].mxu0 }
 0x100   : > { %649 = vst [vmem:[%s1054_s20 + $0x70] sm:$0xff] %v847_v58  ;;  %v879_v59 = vpop.f32.mrb[12].mxu1  ;;  %v428_v60 = vpop.f32.mrb[13].mxu0 }
 0x101   : > { %681 = vst [vmem:[%s1054_s20 + $0x170] sm:$0xff] %v879_v59  ;;  %647 = vst [vmem:[%s1054_s20 + $0x60] sm:$0xff] %v428_v60  ;;  %v556_v61 = vpop.f32.mrb[13].mxu1  ;;  %v848_v62 = vpop.f32.mrb[14].mxu0 }
 0x102   : > { %679 = vst [vmem:[%s1054_s20 + $0x160] sm:$0xff] %v556_v61  ;;  %650 = vst [vmem:[%s1054_s20 + $0x78] sm:$0xff] %v848_v62  ;;  %v880_v63 = vpop.f32.mrb[14].mxu1  ;;  %v431_v0 = vpop.f32.mrb[15].mxu0 }
 0x103   : > { %682 = vst [vmem:[%s1054_s20 + $0x178] sm:$0xff] %v880_v63  ;;  %648 = vst [vmem:[%s1054_s20 + $0x68] sm:$0xff] %v431_v0  ;;  %v559_v1 = vpop.f32.mrb[15].mxu1 }
 0x104   : > { %680 = vst [vmem:[%s1054_s20 + $0x168] sm:$0xff] %v559_v1 }
 0x107   : > { %v851_v2 = vpop.f32.mrb[16].mxu0 }
 0x108   : > { %653 = vst [vmem:[%s1054_s20 + $0x90] sm:$0xff] %v851_v2  ;;  %v883_v3 = vpop.f32.mrb[16].mxu1  ;;  %v444_v4 = vpop.f32.mrb[17].mxu0 }
 0x109   : > { %685 = vst [vmem:[%s1054_s20 + $0x190] sm:$0xff] %v883_v3  ;;  %651 = vst [vmem:[%s1054_s20 + $0x80] sm:$0xff] %v444_v4  ;;  %v572_v5 = vpop.f32.mrb[17].mxu1  ;;  %v852_v6 = vpop.f32.mrb[18].mxu0 }
 0x10a   : > { %683 = vst [vmem:[%s1054_s20 + $0x180] sm:$0xff] %v572_v5  ;;  %654 = vst [vmem:[%s1054_s20 + $0x98] sm:$0xff] %v852_v6  ;;  %v884_v7 = vpop.f32.mrb[18].mxu1  ;;  %v447_v8 = vpop.f32.mrb[19].mxu0 }
 0x10b   : > { %686 = vst [vmem:[%s1054_s20 + $0x198] sm:$0xff] %v884_v7  ;;  %652 = vst [vmem:[%s1054_s20 + $0x88] sm:$0xff] %v447_v8  ;;  %v575_v9 = vpop.f32.mrb[19].mxu1 }
 0x10c   : > { %684 = vst [vmem:[%s1054_s20 + $0x188] sm:$0xff] %v575_v9 }
 0x10f   : > { %v855_v10 = vpop.f32.mrb[20].mxu0 }
 0x110   : > { %657 = vst [vmem:[%s1054_s20 + $0xb0] sm:$0xff] %v855_v10  ;;  %v887_v11 = vpop.f32.mrb[20].mxu1  ;;  %v460_v12 = vpop.f32.mrb[21].mxu0 }
 0x111   : > { %689 = vst [vmem:[%s1054_s20 + $0x1b0] sm:$0xff] %v887_v11  ;;  %655 = vst [vmem:[%s1054_s20 + $0xa0] sm:$0xff] %v460_v12  ;;  %v588_v13 = vpop.f32.mrb[21].mxu1  ;;  %v856_v14 = vpop.f32.mrb[22].mxu0 }
 0x112   : > { %687 = vst [vmem:[%s1054_s20 + $0x1a0] sm:$0xff] %v588_v13  ;;  %658 = vst [vmem:[%s1054_s20 + $0xb8] sm:$0xff] %v856_v14  ;;  %v888_v15 = vpop.f32.mrb[22].mxu1  ;;  %v463_v16 = vpop.f32.mrb[23].mxu0 }
 0x113   : > { %690 = vst [vmem:[%s1054_s20 + $0x1b8] sm:$0xff] %v888_v15  ;;  %656 = vst [vmem:[%s1054_s20 + $0xa8] sm:$0xff] %v463_v16  ;;  %v591_v17 = vpop.f32.mrb[23].mxu1 }
 0x114   : > { %688 = vst [vmem:[%s1054_s20 + $0x1a8] sm:$0xff] %v591_v17 }
 0x117   : > { %v859_v18 = vpop.f32.mrb[24].mxu0 }
 0x118   : > { %661 = vst [vmem:[%s1054_s20 + $0xd0] sm:$0xff] %v859_v18  ;;  %v891_v19 = vpop.f32.mrb[24].mxu1  ;;  %v476_v20 = vpop.f32.mrb[25].mxu0 }
 0x119   : > { %693 = vst [vmem:[%s1054_s20 + $0x1d0] sm:$0xff] %v891_v19  ;;  %659 = vst [vmem:[%s1054_s20 + $0xc0] sm:$0xff] %v476_v20  ;;  %v604_v21 = vpop.f32.mrb[25].mxu1  ;;  %v860_v22 = vpop.f32.mrb[26].mxu0 }
 0x11a   : > { %691 = vst [vmem:[%s1054_s20 + $0x1c0] sm:$0xff] %v604_v21  ;;  %662 = vst [vmem:[%s1054_s20 + $0xd8] sm:$0xff] %v860_v22  ;;  %v892_v23 = vpop.f32.mrb[26].mxu1  ;;  %v479_v24 = vpop.f32.mrb[27].mxu0 }
 0x11b   : > { %694 = vst [vmem:[%s1054_s20 + $0x1d8] sm:$0xff] %v892_v23  ;;  %660 = vst [vmem:[%s1054_s20 + $0xc8] sm:$0xff] %v479_v24  ;;  %v607_v25 = vpop.f32.mrb[27].mxu1 }
 0x11c   : > { %692 = vst [vmem:[%s1054_s20 + $0x1c8] sm:$0xff] %v607_v25 }
 0x11f   : > { %v863_v26 = vpop.f32.mrb[28].mxu0 }
 0x120   : > { %665 = vst [vmem:[%s1054_s20 + $0xf0] sm:$0xff] %v863_v26  ;;  %v895_v27 = vpop.f32.mrb[28].mxu1  ;;  %v492_v28 = vpop.f32.mrb[29].mxu0 }
 0x121   : > { %697 = vst [vmem:[%s1054_s20 + $0x1f0] sm:$0xff] %v895_v27  ;;  %663 = vst [vmem:[%s1054_s20 + $0xe0] sm:$0xff] %v492_v28  ;;  %v620_v29 = vpop.f32.mrb[29].mxu1  ;;  %v864_v30 = vpop.f32.mrb[30].mxu0 }
 0x122   : > { %695 = vst [vmem:[%s1054_s20 + $0x1e0] sm:$0xff] %v620_v29  ;;  %666 = vst [vmem:[%s1054_s20 + $0xf8] sm:$0xff] %v864_v30  ;;  %v896_v31 = vpop.f32.mrb[30].mxu1  ;;  %v495_v32 = vpop.f32.mrb[31].mxu0 }
 0x123   : > { %698 = vst [vmem:[%s1054_s20 + $0x1f8] sm:$0xff] %v896_v31  ;;  %664 = vst [vmem:[%s1054_s20 + $0xe8] sm:$0xff] %v495_v32  ;;  %v623_v33 = vpop.f32.mrb[31].mxu1 }
 0x124   : > { %696 = vst [vmem:[%s1054_s20 + $0x1e8] sm:$0xff] %v623_v33 }
 0x125 PF: > { %s12_s9 = sadd.s32 1, %s915_s9  }
 0x126   : > { %p9_p4 = scmp.ge.s32.totalorder %s12_s9, 6  }
 0x128   :  { %11 = sbr.rel (!%p9_p4) target bundleno = 1 (0x1), region = 58 }

</bundles_post_ra>
